<compile_context>
chip_gen: v5e
topology: v5e:2x2
jax: 0.10.0
libtpu: 0.0.40
codegen_flags: <defaults>
</compile_context>

<pallas_src>
import functools

import numpy as np
import jax
import jax.numpy as jnp
from jax import lax
from jax.experimental import pallas as pl
from jax.experimental.pallas import tpu as pltpu


def _round_up(x, m):
    return (x + m - 1) // m * m


# ----------------------------- Pallas kernels ------------------------------ #

def _conv_kernel(a_ref, w_ref, y_ref, *rest, fuse_relu, compute_stats):
    """K-tiled bf16 matmul with f32 VMEM accumulator.

    Epilogue stores Y (optionally ReLU'd) and, when compute_stats, per-M-tile BN
    partial statistics (sum / sum-of-squares, replicated over 8 sublanes so the
    stats output block satisfies the (8,128) constraint)."""
    if compute_stats:
        psum_ref, psq_ref, acc_ref = rest
    else:
        (acc_ref,) = rest

    k = pl.program_id(1)

    @pl.when(k == 0)
    def _():
        acc_ref[...] = jnp.zeros_like(acc_ref)

    acc_ref[...] += jnp.dot(a_ref[...], w_ref[...],
                            preferred_element_type=jnp.float32)

    @pl.when(k == pl.num_programs(1) - 1)
    def _():
        y = acc_ref[...]
        if fuse_relu:                       # static: only for the no-BN path
            y = jnp.maximum(y, 0.0)
        y_ref[...] = y
        if compute_stats:
            s = jnp.sum(y, axis=0, keepdims=True)
            sq = jnp.sum(y * y, axis=0, keepdims=True)
            psum_ref[...] = jnp.broadcast_to(s, psum_ref.shape)
            psq_ref[...] = jnp.broadcast_to(sq, psq_ref.shape)


def _scale_shift_relu_kernel(y_ref, scale_ref, shift_ref, o_ref, *, apply_relu):
    o = y_ref[...] * scale_ref[...] + shift_ref[...]
    if apply_relu:
        o = jnp.maximum(o, 0.0)
    o_ref[...] = o


# ------------------------------- glue (JAX) -------------------------------- #

def _compute_pad(k, s, size):
    if size % s == 0:
        return max(k - s, 0)
    return max(k - size % s, 0)


def _im2col(xp, kernel_shape, stride, out_spatial):
    kt, kh, kw = kernel_shape
    st, sh, sw = stride
    N, Cin = xp.shape[0], xp.shape[1]
    To, Ho, Wo = out_spatial
    cols = []
    for dt in range(kt):
        for dh in range(kh):
            for dw in range(kw):
                patch = xp[:, :,
                           dt:dt + (To - 1) * st + 1:st,
                           dh:dh + (Ho - 1) * sh + 1:sh,
                           dw:dw + (Wo - 1) * sw + 1:sw]
                cols.append(patch)
    cols = jnp.stack(cols, axis=0)                  # (KTHW, N, Cin, To, Ho, Wo)
    cols = jnp.transpose(cols, (1, 3, 4, 5, 2, 0))  # (N, To, Ho, Wo, Cin, KTHW)
    return cols.reshape(N * To * Ho * Wo, Cin * kt * kh * kw)


def unit3d_forward(x, weight, gamma, beta, *, kernel_shape, stride,
                   use_batch_norm=True, use_relu=True, eps=1e-3):
    """Pallas implementation of Unit3D.forward (bias=False). x: (N, Cin, T, H, W) f32."""
    N, Cin, T, H, W = x.shape
    Cout = weight.shape[0]
    kt, kh, kw = kernel_shape
    st, sh, sw = stride

    To = (T + st - 1) // st
    Ho = (H + sh - 1) // sh
    Wo = (W + sw - 1) // sw

    pad_t = _compute_pad(kt, st, T)
    pad_h = _compute_pad(kh, sh, H)
    pad_w = _compute_pad(kw, sw, W)
    pads = ((pad_t // 2, pad_t - pad_t // 2),
            (pad_h // 2, pad_h - pad_h // 2),
            (pad_w // 2, pad_w - pad_w // 2))

    # bf16 inputs for the MXU path (accumulation stays f32 inside the kernel).
    xp = jnp.pad(x.astype(jnp.bfloat16), ((0, 0), (0, 0)) + pads)

    # TODO(synk): im2col still materializes a kT*kH*kW-inflated matrix (now bf16);
    # a fully in-kernel gather (pl.ANY padded-x + strided DMA) would remove the
    # remaining k-fold input re-read.
    A = _im2col(xp, kernel_shape, stride, (To, Ho, Wo))          # (M, K) bf16
    K = Cin * kt * kh * kw
    M = N * To * Ho * Wo
    Wm = weight.reshape(Cout, K).T.astype(jnp.bfloat16)          # (K, Cout) bf16

    # Tiling: lane-dense output channels, large M tiles, K tiled for VMEM (v7x: 64 MiB).
    Cout_p = _round_up(Cout, 128)
    TM = min(512, _round_up(M, 16))     # 16-multiple -> valid bf16/f32 sublane tiling
    Mp = _round_up(M, TM)
    TK = _round_up(K, 128) if K <= 1024 else 512
    Kp = _round_up(K, TK)

    A = jnp.pad(A, ((0, Mp - M), (0, Kp - K)))                   # zero rows/cols
    Wm = jnp.pad(Wm, ((0, Kp - K), (0, Cout_p - Cout)))          # zero cols -> Y pad = 0

    m_tiles = Mp // TM
    k_tiles = Kp // TK
    fuse_relu = (not use_batch_norm) and use_relu

    y_sds = jax.ShapeDtypeStruct((Mp, Cout_p), jnp.float32)
    y_spec = pl.BlockSpec((TM, Cout_p), lambda i, k: (i, 0))
    if use_batch_norm:
        stats_sds = jax.ShapeDtypeStruct((m_tiles * 8, Cout_p), jnp.float32)
        stats_spec = pl.BlockSpec((8, Cout_p), lambda i, k: (i, 0))
        out_shape = (y_sds, stats_sds, stats_sds)
        out_specs = [y_spec, stats_spec, stats_spec]
    else:
        out_shape = y_sds
        out_specs = y_spec

    # ---- kernel 1: conv as bf16 matmul (+ fused BN partial statistics) ----
    res = pl.pallas_call(
        functools.partial(_conv_kernel, fuse_relu=fuse_relu,
                          compute_stats=use_batch_norm),
        out_shape=out_shape,
        grid_spec=pltpu.PrefetchScalarGridSpec(
            num_scalar_prefetch=0, grid=(m_tiles, k_tiles),
            in_specs=[pl.BlockSpec((TM, TK), lambda i, k: (i, k)),
                      pl.BlockSpec((TK, Cout_p), lambda i, k: (k, 0))],
            out_specs=out_specs,
            scratch_shapes=[pltpu.VMEM((TM, Cout_p), jnp.float32)]),
        compiler_params=pltpu.CompilerParams(
            dimension_semantics=("parallel", "arbitrary"),
            vmem_limit_bytes=64 * 1024 * 1024),
    )(A, Wm)

    if use_batch_norm:
        Y, psum_part, psq_part = res
        # Partials are replicated across 8 sublanes per M tile -> take one row per tile.
        ysum = jnp.sum(psum_part.reshape(m_tiles, 8, Cout_p)[:, 0, :], axis=0)
        ysq = jnp.sum(psq_part.reshape(m_tiles, 8, Cout_p)[:, 0, :], axis=0)
        # Padded rows of A are zero -> contribute 0; divide by the true M.
        mean = ysum / float(M)
        var = jnp.maximum(ysq / float(M) - mean * mean, 0.0)     # biased (training BN)
        inv = lax.rsqrt(var + eps)
        gamma_p = jnp.pad(gamma.astype(jnp.float32), (0, Cout_p - Cout))
        beta_p = jnp.pad(beta.astype(jnp.float32), (0, Cout_p - Cout))
        scale = (gamma_p * inv).reshape(1, Cout_p)
        shift = (beta_p - mean * gamma_p * inv).reshape(1, Cout_p)

        # ---- kernel 2: fused scale/shift (BN) + ReLU, in place on Y ----
        out = pl.pallas_call(
            functools.partial(_scale_shift_relu_kernel, apply_relu=use_relu),
            out_shape=jax.ShapeDtypeStruct((Mp, Cout_p), jnp.float32),
            grid_spec=pltpu.PrefetchScalarGridSpec(
                num_scalar_prefetch=0, grid=(m_tiles,),
                in_specs=[pl.BlockSpec((TM, Cout_p), lambda i: (i, 0)),
                          pl.BlockSpec((1, Cout_p), lambda i: (0, 0)),
                          pl.BlockSpec((1, Cout_p), lambda i: (0, 0))],
                out_specs=pl.BlockSpec((TM, Cout_p), lambda i: (i, 0))),
            input_output_aliases={0: 0},
            compiler_params=pltpu.CompilerParams(
                dimension_semantics=("parallel",)),
        )(Y, scale, shift)
    else:
        out = res   # ReLU (if requested) already fused in the matmul epilogue.

    # back to NCDHW
    out = out[:M, :Cout].reshape(N, To, Ho, Wo, Cout)
    return jnp.transpose(out, (0, 4, 1, 2, 3))


# ------------------------------ reference ---------------------------------- #

def unit3d_reference(x, weight, gamma, beta, *, kernel_shape, stride, eps=1e-3):
    kt, kh, kw = kernel_shape
    st, sh, sw = stride
    _, _, T, H, W = x.shape
    pad_t = _compute_pad(kt, st, T)
    pad_h = _compute_pad(kh, sh, H)
    pad_w = _compute_pad(kw, sw, W)
    pads = [(pad_t // 2, pad_t - pad_t // 2),
            (pad_h // 2, pad_h - pad_h // 2),
            (pad_w // 2, pad_w - pad_w // 2)]
    y = lax.conv_general_dilated(
        x, weight, window_strides=(st, sh, sw), padding=pads,
        dimension_numbers=("NCDHW", "OIDHW", "NCDHW"),
        precision=lax.Precision.HIGHEST)
    mean = y.mean(axis=(0, 2, 3, 4), keepdims=True)
    var = y.var(axis=(0, 2, 3, 4), keepdims=True)
    y = (y - mean) / jnp.sqrt(var + eps)
    y = y * gamma.reshape(1, -1, 1, 1, 1) + beta.reshape(1, -1, 1, 1, 1)
    return jnp.maximum(y, 0.0)


# --------------------------------- main ------------------------------------ #

if __name__ == "__main__":
    key = jax.random.PRNGKey(0)
    k_x, k_w = jax.random.split(key)

    # Module config: Unit3D(in_channels=4, output_channels=8,
    #                       kernel_shape=(3,3,3), stride=(1,2,2)), bias=False (default)
    in_channels, out_channels = 4, 8
    kernel_shape = (3, 3, 3)
    stride = (1, 2, 2)

    x = jax.random.normal(k_x, (2, in_channels, 8, 16, 16), dtype=jnp.float32)
    weight = 0.1 * jax.random.normal(
        k_w, (out_channels, in_channels) + kernel_shape, dtype=jnp.float32)
    gamma = jnp.ones((out_channels,), dtype=jnp.float32)   # BatchNorm3d default init
    beta = jnp.zeros((out_channels,), dtype=jnp.float32)

    fwd = jax.jit(functools.partial(unit3d_forward,
                                    kernel_shape=kernel_shape, stride=stride))
    out = jax.block_until_ready(fwd(x, weight, gamma, beta))
    assert out.shape == (2, out_channels, 8, 8, 8)

    # (1) kernel-math check: reference fed the same bf16-rounded conv inputs.
    ref_bf16 = unit3d_reference(
        x.astype(jnp.bfloat16).astype(jnp.float32),
        weight.astype(jnp.bfloat16).astype(jnp.float32),
        gamma, beta, kernel_shape=kernel_shape, stride=stride)
    np.testing.assert_allclose(np.asarray(out), np.asarray(ref_bf16),
                               rtol=2e-3, atol=2e-3)

    # (2) fidelity vs. full-f32 module semantics (bf16 MXU inputs -> looser tolerance).
    ref_f32 = unit3d_reference(x, weight, gamma, beta,
                               kernel_shape=kernel_shape, stride=stride)
    np.testing.assert_allclose(np.asarray(out), np.asarray(ref_f32),
                               rtol=5e-2, atol=5e-2)

    print("KERNEL_OK")
</pallas_src>

<mosaic_0001>
module attributes {stable_mosaic.version = 11 : i64} {
  func.func @_conv_kernel(%arg0: i32, %arg1: i32, %arg2: memref<512x128xbf16, #tpu.memory_space<vmem>>, %arg3: memref<128x128xbf16, #tpu.memory_space<vmem>>, %arg4: memref<512x128xf32, #tpu.memory_space<vmem>>, %arg5: memref<8x128xf32, #tpu.memory_space<vmem>>, %arg6: memref<8x128xf32, #tpu.memory_space<vmem>>, %arg7: memref<512x128xf32, #tpu.memory_space<vmem>>) attributes {dimension_semantics = [#tpu.dimension_semantics<parallel>, #tpu.dimension_semantics<arbitrary>], iteration_bounds = array<i64: 2, 1>, scalar_prefetch = 0 : i64, scratch_operands = 1 : i64, tpu.core_type = #tpu.core_type<tc>, window_params = [{transform_indices = @transform_0, window_bounds = array<i64: 512, 128>}, {transform_indices = @transform_1, window_bounds = array<i64: 128, 128>}, {transform_indices = @transform_2, window_bounds = array<i64: 512, 128>}, {transform_indices = @transform_3, window_bounds = array<i64: 8, 128>}, {transform_indices = @transform_4, window_bounds = array<i64: 8, 128>}]} {
    %c0_i32 = arith.constant 0 : i32
    %0 = arith.cmpi eq, %arg1, %c0_i32 : i32
    %1 = arith.extui %0 : i1 to i32
    %c0_i32_0 = arith.constant 0 : i32
    %2 = arith.cmpi ne, %1, %c0_i32_0 : i32
    scf.if %2 {
      %cst_10 = arith.constant 0.000000e+00 : f32
      %12 = vector.broadcast %cst_10 : f32 to vector<512x128xf32>
      %c0_11 = arith.constant 0 : index
      %c0_12 = arith.constant 0 : index
      %13 = vector.load %arg7[%c0_11, %c0_12] : memref<512x128xf32, #tpu.memory_space<vmem>>, vector<512x128xf32>
      tpu.vector_store %arg7[%c0_11, %c0_12], %12 {strides = array<i32>} : memref<512x128xf32, #tpu.memory_space<vmem>>, vector<512x128xf32>,
    } else {
    }
    %c0 = arith.constant 0 : index
    %c0_1 = arith.constant 0 : index
    %3 = vector.load %arg7[%c0, %c0_1] : memref<512x128xf32, #tpu.memory_space<vmem>>, vector<512x128xf32>
    %c0_2 = arith.constant 0 : index
    %c0_3 = arith.constant 0 : index
    %4 = vector.load %arg2[%c0_2, %c0_3] : memref<512x128xbf16, #tpu.memory_space<vmem>>, vector<512x128xbf16>
    %c0_4 = arith.constant 0 : index
    %c0_5 = arith.constant 0 : index
    %5 = vector.load %arg3[%c0_4, %c0_5] : memref<128x128xbf16, #tpu.memory_space<vmem>>, vector<128x128xbf16>
    %cst = arith.constant dense<0.000000e+00> : vector<512x128xf32>
    %6 = tpu.matmul %4, %5, %cst {dimension_numbers = #tpu.dot_dimension_numbers<[1], [0], [0], [1], [0, 0, 1, 1], [], []>} : vector<512x128xbf16>, vector<128x128xbf16>, vector<512x128xf32> -> vector<512x128xf32>
    %7 = arith.addf %3, %6 : vector<512x128xf32>
    %c0_6 = arith.constant 0 : index
    %c0_7 = arith.constant 0 : index
    %8 = vector.load %arg7[%c0_6, %c0_7] : memref<512x128xf32, #tpu.memory_space<vmem>>, vector<512x128xf32>
    tpu.vector_store %arg7[%c0_6, %c0_7], %7 {strides = array<i32>} : memref<512x128xf32, #tpu.memory_space<vmem>>, vector<512x128xf32>,
    %c0_i32_8 = arith.constant 0 : i32
    %9 = arith.cmpi eq, %arg1, %c0_i32_8 : i32
    %10 = arith.extui %9 : i1 to i32
    %c0_i32_9 = arith.constant 0 : i32
    %11 = arith.cmpi ne, %10, %c0_i32_9 : i32
    scf.if %11 {
      %c0_10 = arith.constant 0 : index
      %c0_11 = arith.constant 0 : index
      %12 = vector.load %arg7[%c0_10, %c0_11] : memref<512x128xf32, #tpu.memory_space<vmem>>, vector<512x128xf32>
      %c0_12 = arith.constant 0 : index
      %c0_13 = arith.constant 0 : index
      %13 = vector.load %arg4[%c0_12, %c0_13] : memref<512x128xf32, #tpu.memory_space<vmem>>, vector<512x128xf32>
      tpu.vector_store %arg4[%c0_12, %c0_13], %12 {strides = array<i32>} : memref<512x128xf32, #tpu.memory_space<vmem>>, vector<512x128xf32>,
      %cst_14 = arith.constant dense<0.000000e+00> : vector<128xf32>
      %14 = vector.multi_reduction <add>, %12, %cst_14 [0] : vector<512x128xf32> to vector<128xf32>
      %15 = vector.shape_cast %14 : vector<128xf32> to vector<1x128xf32>
      %16 = arith.mulf %12, %12 : vector<512x128xf32>
      %cst_15 = arith.constant dense<0.000000e+00> : vector<128xf32>
      %17 = vector.multi_reduction <add>, %16, %cst_15 [0] : vector<512x128xf32> to vector<128xf32>
      %18 = vector.shape_cast %17 : vector<128xf32> to vector<1x128xf32>
      %19 = vector.shape_cast %15 : vector<1x128xf32> to vector<1x128xf32>
      %20 = vector.broadcast %19 : vector<1x128xf32> to vector<8x128xf32>
      %c0_16 = arith.constant 0 : index
      %c0_17 = arith.constant 0 : index
      %21 = vector.load %arg5[%c0_16, %c0_17] : memref<8x128xf32, #tpu.memory_space<vmem>>, vector<8x128xf32>
      tpu.vector_store %arg5[%c0_16, %c0_17], %20 {strides = array<i32>} : memref<8x128xf32, #tpu.memory_space<vmem>>, vector<8x128xf32>,
      %22 = vector.shape_cast %18 : vector<1x128xf32> to vector<1x128xf32>
      %23 = vector.broadcast %22 : vector<1x128xf32> to vector<8x128xf32>
      %c0_18 = arith.constant 0 : index
      %c0_19 = arith.constant 0 : index
      %24 = vector.load %arg6[%c0_18, %c0_19] : memref<8x128xf32, #tpu.memory_space<vmem>>, vector<8x128xf32>
      tpu.vector_store %arg6[%c0_18, %c0_19], %23 {strides = array<i32>} : memref<8x128xf32, #tpu.memory_space<vmem>>, vector<8x128xf32>,
    } else {
    }
    return
  }
  func.func @transform_0(%arg0: i32, %arg1: i32) -> (i32, i32) {
    %c0_i32 = arith.constant 0 : i32
    return %arg0, %arg1 : i32, i32
  }
  func.func @transform_1(%arg0: i32, %arg1: i32) -> (i32, i32) {
    %c0_i32 = arith.constant 0 : i32
    %c0_i32_0 = arith.constant 0 : i32
    return %arg1, %c0_i32 : i32, i32
  }
  func.func @transform_2(%arg0: i32, %arg1: i32) -> (i32, i32) {
    %c0_i32 = arith.constant 0 : i32
    %c0_i32_0 = arith.constant 0 : i32
    return %arg0, %c0_i32 : i32, i32
  }
  func.func @transform_3(%arg0: i32, %arg1: i32) -> (i32, i32) {
    %c0_i32 = arith.constant 0 : i32
    %c0_i32_0 = arith.constant 0 : i32
    return %arg0, %c0_i32 : i32, i32
  }
  func.func @transform_4(%arg0: i32, %arg1: i32) -> (i32, i32) {
    %c0_i32 = arith.constant 0 : i32
    %c0_i32_0 = arith.constant 0 : i32
    return %arg0, %c0_i32 : i32, i32
  }
}

module attributes {stable_mosaic.version = 11 : i64} {
  func.func @_scale_shift_relu_kernel(%arg0: i32, %arg1: memref<512x128xf32, #tpu.memory_space<vmem>>, %arg2: memref<1x128xf32, #tpu.memory_space<vmem>>, %arg3: memref<1x128xf32, #tpu.memory_space<vmem>>, %arg4: memref<512x128xf32, #tpu.memory_space<vmem>>) attributes {dimension_semantics = [#tpu.dimension_semantics<parallel>], iteration_bounds = array<i64: 2>, scalar_prefetch = 0 : i64, scratch_operands = 0 : i64, tpu.core_type = #tpu.core_type<tc>, window_params = [{transform_indices = @transform_0, window_bounds = array<i64: 512, 128>}, {pipeline_mode = #tpu.pipeline_mode<synchronous>, transform_indices = @transform_1, window_bounds = array<i64: 1, 128>}, {pipeline_mode = #tpu.pipeline_mode<synchronous>, transform_indices = @transform_2, window_bounds = array<i64: 1, 128>}, {transform_indices = @transform_3, window_bounds = array<i64: 512, 128>}]} {
    %c0 = arith.constant 0 : index
    %c0_0 = arith.constant 0 : index
    %0 = vector.load %arg1[%c0, %c0_0] : memref<512x128xf32, #tpu.memory_space<vmem>>, vector<512x128xf32>
    %c0_1 = arith.constant 0 : index
    %c0_2 = arith.constant 0 : index
    %1 = vector.load %arg2[%c0_1, %c0_2] : memref<1x128xf32, #tpu.memory_space<vmem>>, vector<1x128xf32>
    %2 = vector.broadcast %1 : vector<1x128xf32> to vector<512x128xf32>
    %3 = arith.mulf %0, %2 : vector<512x128xf32>
    %c0_3 = arith.constant 0 : index
    %c0_4 = arith.constant 0 : index
    %4 = vector.load %arg3[%c0_3, %c0_4] : memref<1x128xf32, #tpu.memory_space<vmem>>, vector<1x128xf32>
    %5 = vector.broadcast %4 : vector<1x128xf32> to vector<512x128xf32>
    %6 = arith.addf %3, %5 : vector<512x128xf32>
    %cst = arith.constant 0.000000e+00 : f32
    %7 = vector.broadcast %cst : f32 to vector<512x128xf32>
    %8 = arith.maximumf %6, %7 : vector<512x128xf32>
    %c0_5 = arith.constant 0 : index
    %c0_6 = arith.constant 0 : index
    %9 = vector.load %arg4[%c0_5, %c0_6] : memref<512x128xf32, #tpu.memory_space<vmem>>, vector<512x128xf32>
    tpu.vector_store %arg4[%c0_5, %c0_6], %8 {strides = array<i32>} : memref<512x128xf32, #tpu.memory_space<vmem>>, vector<512x128xf32>,
    return
  }
  func.func @transform_0(%arg0: i32) -> (i32, i32) {
    %c0_i32 = arith.constant 0 : i32
    %c0_i32_0 = arith.constant 0 : i32
    return %arg0, %c0_i32 : i32, i32
  }
  func.func @transform_1(%arg0: i32) -> (i32, i32) {
    %c0_i32 = arith.constant 0 : i32
    %c0_i32_0 = arith.constant 0 : i32
    %c0_i32_1 = arith.constant 0 : i32
    return %c0_i32, %c0_i32_0 : i32, i32
  }
  func.func @transform_2(%arg0: i32) -> (i32, i32) {
    %c0_i32 = arith.constant 0 : i32
    %c0_i32_0 = arith.constant 0 : i32
    %c0_i32_1 = arith.constant 0 : i32
    return %c0_i32, %c0_i32_0 : i32, i32
  }
  func.func @transform_3(%arg0: i32) -> (i32, i32) {
    %c0_i32 = arith.constant 0 : i32
    %c0_i32_0 = arith.constant 0 : i32
    return %arg0, %c0_i32 : i32, i32
  }
}

</mosaic_0001>

<bundles_post_ra>
// kernel: unit3d_forward.3
= control target key start
LH: loop header
LB: loop body
LE: loop exit
PB: predicated region body
PF: predicated region fallthrough
CT: control target
= control target key end

     0   :  { %s607_s12 = smov 0   ;;  %s1086_s0 = inlined_call_operand.vmem [shape: f32[1024,128], index: 0, kind: input, shape index: {}, may-alias: {0,3}]   ;;  %s1087_s1 = inlined_call_operand.vmem [shape: f32[1,128], index: 1, kind: input, shape index: {}]   ;;  %s1088_s2 = inlined_call_operand.vmem [shape: f32[1,128], index: 2, kind: input, shape index: {}]   ;;  %s1089_s3 = inlined_call_operand.vmem [shape: f32[1024,128], index: 3, kind: output, shape index: {}, may-alias: {0,3}]  }
   0x1 LB: > { %s558_s13 = sadd.s32 4294967295, %s585_s12   ;;  %p562_p0 = scmp.ge.s32.totalorder %s585_s12, 1  ;;  %s585_s12 = sphi %s607_s12, %s13_s12  }
   0x2   : > { %p138_p1 = scmp.lt.s32.totalorder %s585_s12, 3 }
   0x4   : > { %p139_p2 = pnand %p562_p0, %p138_p1 }
   0x6   : > { %142 = sbr.rel (%p139_p2) target bundleno = 108 (0x6c), region = 32 }
   0xb   : > { %s563_s14 = sshll.u32 %s558_s13, 6  ;;  %v628_v0 = vld [vmem:[%s1087_s1] ss:$0 sm:$0xff] }
   0xc   : > { %p163_p3 = scmp.lt.s32.totalorder %s563_s14, 127  ;;  %v638_v6 = vld [vmem:[%s1088_s2] ss:$0 sm:$0xff] }
   0xe   : > { %s1110_s14 = smov (!%p163_p3, %s563_s14), 127 }
   0xf   : > { %s564_s15 = sshll.u32 %s1110_s14, 3 }
  0x10   : > { %s623_s18 = scalar_lea.vmem %s1086_s0, %s564_s15  ;;  %s689_s25 = scalar_lea.vmem %s1089_s3, %s564_s15 }
  0x11   : > { %v174_v1 = vld [vmem:[%s623_s18] sm:$0xff]  ;;  %v175_v2 = vld [vmem:[%s623_s18 + $0x8] sm:$0xff]  ;;  %v176_v3 = vld [vmem:[%s623_s18 + $0x10] sm:$0xff] }
  0x12   : > { %v177_v4 = vld [vmem:[%s623_s18 + $0x18] sm:$0xff]  ;;  %v242_v5 = vmul.f32 %v628_v0, %v174_v1  ;;  %v178_v7 = vld [vmem:[%s623_s18 + $0x20] sm:$0xff]  ;;  %v243_v8 = vmul.f32 %v628_v0, %v175_v2  ;;  %v179_v9 = vld [vmem:[%s623_s18 + $0x28] sm:$0xff]  ;;  %v244_v10 = vmul.f32 %v628_v0, %v176_v3 }
  0x13   : > { %v180_v11 = vld [vmem:[%s623_s18 + $0x30] sm:$0xff]  ;;  %v245_v12 = vmul.f32 %v628_v0, %v177_v4  ;;  %v181_v13 = vld [vmem:[%s623_s18 + $0x38] sm:$0xff]  ;;  %v246_v15 = vmul.f32 %v628_v0, %v178_v7  ;;  %v182_v16 = vld [vmem:[%s623_s18 + $0x40] sm:$0xff]  ;;  %v247_v18 = vmul.f32 %v628_v0, %v179_v9 }
  0x14   : > { %v648_v14 = vadd.f32 %v638_v6, %v242_v5  ;;  %v653_v17 = vadd.f32 %v638_v6, %v243_v8  ;;  %v183_v19 = vld [vmem:[%s623_s18 + $0x48] sm:$0xff]  ;;  %v658_v20 = vadd.f32 %v638_v6, %v244_v10  ;;  %v248_v21 = vmul.f32 %v628_v0, %v180_v11  ;;  %v184_v22 = vld [vmem:[%s623_s18 + $0x50] sm:$0xff]  ;;  %v669_v25 = vld [vmem:[%s623_s18 + $0x58] sm:$0xff] }
  0x15   : > { %v663_v23 = vadd.f32 %v638_v6, %v245_v12  ;;  %v666_v24 = vmul.f32 %v628_v0, %v181_v13  ;;  %v672_v26 = vld [vmem:[%s623_s18 + $0x60] sm:$0xff]  ;;  %v675_v27 = vld [vmem:[%s623_s18 + $0x68] sm:$0xff]  ;;  %v679_v29 = vadd.f32 %v638_v6, %v246_v15  ;;  %v682_v30 = vmul.f32 %v628_v0, %v182_v16  ;;  %v692_v31 = vld [vmem:[%s623_s18 + $0x70] sm:$0xff] }
  0x16   : > { %v695_v32 = vld [vmem:[%s623_s18 + $0x78] sm:$0xff]  ;;  %v698_v33 = vld [vmem:[%s623_s18 + $0x80] sm:$0xff]  ;;  %v701_v34 = vld [vmem:[%s623_s18 + $0x88] sm:$0xff]  ;;  %v375_v13 = vmax.f32 %v653_v17, 0.0  ;;  %v315_v15 = vadd.f32 %v638_v6, %v247_v18  ;;  %v251_v16 = vmul.f32 %v628_v0, %v183_v19 }
  0x17   : > { %v704_v35 = vld [vmem:[%s623_s18 + $0x90] sm:$0xff]  ;;  %v707_v36 = vld [vmem:[%s623_s18 + $0x98] sm:$0xff]  ;;  %v710_v37 = vld [vmem:[%s623_s18 + $0xa0] sm:$0xff]  ;;  %v377_v19 = vmax.f32 %v663_v23, 0.0 }
  0x18   : > { %v713_v38 = vld [vmem:[%s623_s18 + $0xa8] sm:$0xff]  ;;  %v716_v39 = vld [vmem:[%s623_s18 + $0xb0] sm:$0xff]  ;;  %v719_v40 = vld [vmem:[%s623_s18 + $0xb8] sm:$0xff]  ;;  %v379_v23 = vmax.f32 %v315_v15, 0.0 }
  0x19   : > { %v722_v41 = vld [vmem:[%s623_s18 + $0xc0] sm:$0xff]  ;;  %v725_v42 = vld [vmem:[%s623_s18 + $0xc8] sm:$0xff]  ;;  %v728_v43 = vld [vmem:[%s623_s18 + $0xd0] sm:$0xff] }
  0x1a   : > { %v731_v44 = vld [vmem:[%s623_s18 + $0xd8] sm:$0xff]  ;;  %v734_v45 = vld [vmem:[%s623_s18 + $0xe0] sm:$0xff]  ;;  %v737_v46 = vld [vmem:[%s623_s18 + $0xe8] sm:$0xff] }
  0x1b   : > { %v740_v47 = vld [vmem:[%s623_s18 + $0xf0] sm:$0xff]  ;;  %v743_v48 = vld [vmem:[%s623_s18 + $0xf8] sm:$0xff]  ;;  %v746_v49 = vld [vmem:[%s623_s18 + $0x100] sm:$0xff] }
  0x1c   : > { %v749_v50 = vld [vmem:[%s623_s18 + $0x108] sm:$0xff]  ;;  %v752_v51 = vld [vmem:[%s623_s18 + $0x110] sm:$0xff]  ;;  %v755_v52 = vld [vmem:[%s623_s18 + $0x118] sm:$0xff] }
  0x1d   : > { %v758_v53 = vld [vmem:[%s623_s18 + $0x120] sm:$0xff]  ;;  %v761_v54 = vld [vmem:[%s623_s18 + $0x128] sm:$0xff]  ;;  %v764_v55 = vld [vmem:[%s623_s18 + $0x130] sm:$0xff] }
  0x1e   : > { %v767_v56 = vld [vmem:[%s623_s18 + $0x138] sm:$0xff]  ;;  %v770_v57 = vld [vmem:[%s623_s18 + $0x140] sm:$0xff]  ;;  %v773_v58 = vld [vmem:[%s623_s18 + $0x148] sm:$0xff] }
  0x1f   : > { %v776_v59 = vld [vmem:[%s623_s18 + $0x150] sm:$0xff]  ;;  %v779_v60 = vld [vmem:[%s623_s18 + $0x158] sm:$0xff]  ;;  %v782_v61 = vld [vmem:[%s623_s18 + $0x160] sm:$0xff] }
  0x20   : > { %v785_v62 = vld [vmem:[%s623_s18 + $0x168] sm:$0xff]  ;;  %v788_v63 = vld [vmem:[%s623_s18 + $0x170] sm:$0xff]  ;;  %v791_v1 = vld [vmem:[%s623_s18 + $0x178] sm:$0xff] }
  0x21   : > { %v794_v2 = vld [vmem:[%s623_s18 + $0x180] sm:$0xff]  ;;  %v797_v3 = vld [vmem:[%s623_s18 + $0x188] sm:$0xff]  ;;  %v800_v4 = vld [vmem:[%s623_s18 + $0x190] sm:$0xff] }
  0x22   : > { %v803_v5 = vld [vmem:[%s623_s18 + $0x198] sm:$0xff]  ;;  %v806_v7 = vld [vmem:[%s623_s18 + $0x1a0] sm:$0xff]  ;;  %v809_v8 = vld [vmem:[%s623_s18 + $0x1a8] sm:$0xff] }
  0x23   : > { %1090 = vst [vmem:[#allocation2_spill] sm:$0xff] %v806_v7  ;;  %v812_v9 = vld [vmem:[%s623_s18 + $0x1b0] sm:$0xff]  ;;  %v815_v10 = vld [vmem:[%s623_s18 + $0x1b8] sm:$0xff]  ;;  %v818_v11 = vld [vmem:[%s623_s18 + $0x1c0] sm:$0xff] }
  0x24   : > { %1091 = vst [vmem:[#allocation3_spill] sm:$0xff] %v809_v8  ;;  %v821_v12 = vld [vmem:[%s623_s18 + $0x1c8] sm:$0xff]  ;;  %v827_v28 = vld [vmem:[%s623_s18 + $0x1d0] sm:$0xff]  ;;  %v830_v8 = vld [vmem:[%s623_s18 + $0x1d8] sm:$0xff] }
  0x25   : > { %1092 = vst [vmem:[#allocation4_spill] sm:$0xff] %v812_v9  ;;  %v833_v7 = vld [vmem:[%s623_s18 + $0x1e0] sm:$0xff]  ;;  %v839_v9 = vld [vmem:[%s623_s18 + $0x1e8] sm:$0xff]  ;;  %v842_v17 = vld [vmem:[%s623_s18 + $0x1f0] sm:$0xff] }
  0x26   : > { %1093 = vst [vmem:[#allocation5_spill] sm:$0xff] %v815_v10  ;;  %v376_v10 = vmax.f32 %v658_v20, 0.0  ;;  %v845_v18 = vld [vmem:[%s623_s18 + $0x1f8] sm:$0xff]  ;;  %v253_v20 = vmul.f32 %v628_v0, %v669_v25  ;;  %v255_v25 = vmul.f32 %v628_v0, %v675_v27 }
  0x27   : > { %1094 = vst [vmem:[#allocation6_spill] sm:$0xff] %v818_v11  ;;  %v316_v11 = vadd.f32 %v638_v6, %v248_v21  ;;  %v1099_v21 = vmax.f32 %v648_v14, 0.0 }
  0x28   : > { %1095 = vst [vmem:[#allocation7_spill] sm:$0xff] %v821_v12  ;;  %v252_v12 = vmul.f32 %v628_v0, %v184_v22  ;;  %v378_v22 = vmax.f32 %v679_v29, 0.0  ;;  %v256_v29 = vmul.f32 %v628_v0, %v692_v31  ;;  %v323_v31 = vadd.f32 %v638_v6, %v255_v25 }
  0x29   : > { %1096 = vst [vmem:[#allocation8_spill] sm:$0xff] %v830_v8  ;;  %v317_v8 = vadd.f32 %v638_v6, %v666_v24  ;;  %v319_v24 = vadd.f32 %v638_v6, %v251_v16  ;;  %v380_v14 = vmax.f32 %v316_v11, 0.0  ;;  %v260_v16 = vmul.f32 %v628_v0, %v704_v35 }
  0x2a   : > { %1097 = vst [vmem:[#allocation9_spill] sm:$0xff] %v839_v9  ;;  %v254_v9 = vmul.f32 %v628_v0, %v672_v26  ;;  %v321_v26 = vadd.f32 %v638_v6, %v253_v20  ;;  %v262_v20 = vmul.f32 %v628_v0, %v710_v37  ;;  %v264_v25 = vmul.f32 %v628_v0, %v716_v39 }
  0x2b   : > { %1098 = vst [vmem:[#allocation10_spill] sm:$0xff] %v842_v17  ;;  %v318_v17 = vadd.f32 %v638_v6, %v682_v30  ;;  %v381_v30 = vmax.f32 %v317_v8, 0.0  ;;  %v383_v11 = vmax.f32 %v319_v24, 0.0  ;;  %v259_v8 = vmul.f32 %v628_v0, %v701_v34 }
  0x2c   : > { %438 = vst [vmem:[%s689_s25] sm:$0xff] %v1099_v21  ;;  %v320_v21 = vadd.f32 %v638_v6, %v252_v12  ;;  %v322_v27 = vadd.f32 %v638_v6, %v254_v9  ;;  %v385_v9 = vmax.f32 %v321_v26, 0.0 }
  0x2d   : > { %439 = vst [vmem:[%s689_s25 + $0x8] sm:$0xff] %v375_v13  ;;  %v257_v13 = vmul.f32 %v628_v0, %v695_v32  ;;  %v382_v15 = vmax.f32 %v318_v17, 0.0  ;;  %v324_v32 = vadd.f32 %v638_v6, %v256_v29  ;;  %v261_v17 = vmul.f32 %v628_v0, %v707_v36 }
  0x2e   : > { %440 = vst [vmem:[%s689_s25 + $0x10] sm:$0xff] %v376_v10  ;;  %v258_v10 = vmul.f32 %v628_v0, %v698_v33  ;;  %v384_v12 = vmax.f32 %v320_v21, 0.0  ;;  %v327_v35 = vadd.f32 %v638_v6, %v259_v8  ;;  %v328_v36 = vadd.f32 %v638_v6, %v260_v16 }
  0x2f   : > { %441 = vst [vmem:[%s689_s25 + $0x18] sm:$0xff] %v377_v19  ;;  %v325_v33 = vadd.f32 %v638_v6, %v257_v13  ;;  %v386_v19 = vmax.f32 %v322_v27, 0.0  ;;  %v388_v24 = vmax.f32 %v324_v32, 0.0  ;;  %v329_v37 = vadd.f32 %v638_v6, %v261_v17 }
  0x30   : > { %442 = vst [vmem:[%s689_s25 + $0x20] sm:$0xff] %v378_v22  ;;  %v326_v34 = vadd.f32 %v638_v6, %v258_v10  ;;  %v387_v22 = vmax.f32 %v323_v31, 0.0  ;;  %v265_v21 = vmul.f32 %v628_v0, %v719_v40  ;;  %v391_v26 = vmax.f32 %v327_v35, 0.0 }
  0x31   : > { %443 = vst [vmem:[%s689_s25 + $0x28] sm:$0xff] %v379_v23  ;;  %v263_v23 = vmul.f32 %v628_v0, %v713_v38  ;;  %v330_v38 = vadd.f32 %v638_v6, %v262_v20  ;;  %v267_v13 = vmul.f32 %v628_v0, %v725_v42  ;;  %v332_v40 = vadd.f32 %v638_v6, %v264_v25 }
  0x32   : > { %444 = vst [vmem:[%s689_s25 + $0x30] sm:$0xff] %v380_v14  ;;  %v389_v14 = vmax.f32 %v325_v33, 0.0  ;;  %v390_v29 = vmax.f32 %v326_v34, 0.0  ;;  %v268_v27 = vmul.f32 %v628_v0, %v728_v43  ;;  %v393_v10 = vmax.f32 %v329_v37, 0.0 }
  0x33   : > { %445 = vst [vmem:[%s689_s25 + $0x38] sm:$0xff] %v381_v30  ;;  %v266_v30 = vmul.f32 %v628_v0, %v722_v41  ;;  %v331_v39 = vadd.f32 %v638_v6, %v263_v23  ;;  %v333_v41 = vadd.f32 %v638_v6, %v265_v21  ;;  %v394_v31 = vmax.f32 %v330_v38, 0.0 }
  0x34   : > { %446 = vst [vmem:[%s689_s25 + $0x40] sm:$0xff] %v382_v15  ;;  %v392_v15 = vmax.f32 %v328_v36, 0.0  ;;  %v270_v8 = vmul.f32 %v628_v0, %v734_v45  ;;  %v335_v43 = vadd.f32 %v638_v6, %v267_v13  ;;  %v271_v32 = vmul.f32 %v628_v0, %v737_v46 }
  0x35   : > { %447 = vst [vmem:[%s689_s25 + $0x48] sm:$0xff] %v383_v11  ;;  %v269_v11 = vmul.f32 %v628_v0, %v731_v44  ;;  %v334_v42 = vadd.f32 %v638_v6, %v266_v30  ;;  %v396_v16 = vmax.f32 %v332_v40, 0.0  ;;  %v336_v44 = vadd.f32 %v638_v6, %v268_v27 }
  0x36   : > { %448 = vst [vmem:[%s689_s25 + $0x50] sm:$0xff] %v384_v12  ;;  %v395_v12 = vmax.f32 %v331_v39, 0.0  ;;  %v397_v33 = vmax.f32 %v333_v41, 0.0  ;;  %v273_v17 = vmul.f32 %v628_v0, %v743_v48  ;;  %v338_v46 = vadd.f32 %v638_v6, %v270_v8 }
  0x37   : > { %449 = vst [vmem:[%s689_s25 + $0x58] sm:$0xff] %v385_v9  ;;  %v272_v9 = vmul.f32 %v628_v0, %v740_v47  ;;  %v337_v45 = vadd.f32 %v638_v6, %v269_v11  ;;  %v274_v34 = vmul.f32 %v628_v0, %v746_v49  ;;  %v399_v20 = vmax.f32 %v335_v43, 0.0 }
  0x38   : > { %450 = vst [vmem:[%s689_s25 + $0x60] sm:$0xff] %v386_v19  ;;  %v398_v19 = vmax.f32 %v334_v42, 0.0  ;;  %v339_v47 = vadd.f32 %v638_v6, %v271_v32  ;;  %v400_v35 = vmax.f32 %v336_v44, 0.0  ;;  %v276_v23 = vmul.f32 %v628_v0, %v752_v51 }
  0x39   : > { %451 = vst [vmem:[%s689_s25 + $0x68] sm:$0xff] %v387_v22  ;;  %v275_v22 = vmul.f32 %v628_v0, %v749_v50  ;;  %v340_v48 = vadd.f32 %v638_v6, %v272_v9  ;;  %v341_v49 = vadd.f32 %v638_v6, %v273_v17  ;;  %v277_v36 = vmul.f32 %v628_v0, %v755_v52 }
  0x3a   : > { %452 = vst [vmem:[%s689_s25 + $0x70] sm:$0xff] %v388_v24  ;;  %v401_v24 = vmax.f32 %v337_v45, 0.0  ;;  %v402_v25 = vmax.f32 %v338_v46, 0.0  ;;  %v342_v50 = vadd.f32 %v638_v6, %v274_v34  ;;  %v305_v37 = vmul.f32 %v628_v0, %v845_v18 }
  0x3b   : > { %453 = vst [vmem:[%s689_s25 + $0x78] sm:$0xff] %v389_v14  ;;  %v278_v14 = vmul.f32 %v628_v0, %v758_v53  ;;  %v403_v51 = vmax.f32 %v339_v47, 0.0  ;;  %v343_v21 = vadd.f32 %v638_v6, %v275_v22  ;;  %v404_v52 = vmax.f32 %v340_v48, 0.0 }
  0x3c   : > { %454 = vst [vmem:[%s689_s25 + $0x80] sm:$0xff] %v390_v29  ;;  %v279_v29 = vmul.f32 %v628_v0, %v761_v54  ;;  %v344_v38 = vadd.f32 %v638_v6, %v276_v23  ;;  %v280_v30 = vmul.f32 %v628_v0, %v764_v55  ;;  %v967_v53 = vadd.f32 %v638_v6, %v305_v37 }
  0x3d   : > { %455 = vst [vmem:[%s689_s25 + $0x88] sm:$0xff] %v391_v26  ;;  %v405_v18 = vmax.f32 %v341_v49, 0.0  ;;  %v345_v26 = vadd.f32 %v638_v6, %v277_v36  ;;  %v281_v39 = vmul.f32 %v628_v0, %v767_v56  ;;  %v406_v54 = vmax.f32 %v342_v50, 0.0 }
  0x3e   : > { %456 = vst [vmem:[%s689_s25 + $0x90] sm:$0xff] %v392_v15  ;;  %v346_v13 = vadd.f32 %v638_v6, %v278_v14  ;;  %v282_v15 = vmul.f32 %v628_v0, %v770_v57  ;;  %v407_v55 = vmax.f32 %v343_v21, 0.0  ;;  %v347_v40 = vadd.f32 %v638_v6, %v279_v29 }
  0x3f   : > { %457 = vst [vmem:[%s689_s25 + $0x98] sm:$0xff] %v393_v10  ;;  %v283_v27 = vmul.f32 %v628_v0, %v773_v58  ;;  %v408_v10 = vmax.f32 %v344_v38, 0.0  ;;  %v348_v56 = vadd.f32 %v638_v6, %v280_v30  ;;  %v284_v41 = vmul.f32 %v628_v0, %v776_v59  ;;  %v1104_v38 = vld [vmem:[#allocation6_spill] sm:$0xff] }
  0x40   : > { %458 = vst [vmem:[%s689_s25 + $0xa0] sm:$0xff] %v394_v31  ;;  %v409_v11 = vmax.f32 %v345_v26, 0.0  ;;  %v349_v57 = vadd.f32 %v638_v6, %v281_v39  ;;  %v285_v31 = vmul.f32 %v628_v0, %v779_v60  ;;  %v410_v42 = vmax.f32 %v346_v13, 0.0  ;;  %v1105_v39 = vld [vmem:[#allocation7_spill] sm:$0xff] }
  0x41   : > { %459 = vst [vmem:[%s689_s25 + $0xa8] sm:$0xff] %v395_v12  ;;  %v350_v58 = vadd.f32 %v638_v6, %v282_v15  ;;  %v286_v8 = vmul.f32 %v628_v0, %v782_v61  ;;  %v411_v12 = vmax.f32 %v347_v40, 0.0  ;;  %v351_v59 = vadd.f32 %v638_v6, %v283_v27 }
  0x42   : > { %460 = vst [vmem:[%s689_s25 + $0xb0] sm:$0xff] %v396_v16  ;;  %v287_v43 = vmul.f32 %v628_v0, %v785_v62  ;;  %v412_v32 = vmax.f32 %v348_v56, 0.0  ;;  %v352_v60 = vadd.f32 %v638_v6, %v284_v41  ;;  %v288_v16 = vmul.f32 %v628_v0, %v788_v63 }
  0x43   : > { %461 = vst [vmem:[%s689_s25 + $0xb8] sm:$0xff] %v397_v33  ;;  %v413_v44 = vmax.f32 %v349_v57, 0.0  ;;  %v353_v61 = vadd.f32 %v638_v6, %v285_v31  ;;  %v289_v9 = vmul.f32 %v628_v0, %v791_v1  ;;  %v414_v33 = vmax.f32 %v350_v58, 0.0 }
  0x44   : > { %462 = vst [vmem:[%s689_s25 + $0xc0] sm:$0xff] %v398_v19  ;;  %v354_v62 = vadd.f32 %v638_v6, %v286_v8  ;;  %v290_v45 = vmul.f32 %v628_v0, %v794_v2  ;;  %v415_v17 = vmax.f32 %v351_v59, 0.0  ;;  %v355_v63 = vadd.f32 %v638_v6, %v287_v43  ;;  %v1108_v59 = vld [vmem:[#allocation10_spill] sm:$0xff] }
  0x45   : > { %463 = vst [vmem:[%s689_s25 + $0xc8] sm:$0xff] %v399_v20  ;;  %v291_v19 = vmul.f32 %v628_v0, %v797_v3  ;;  %v416_v46 = vmax.f32 %v352_v60, 0.0  ;;  %v356_v1 = vadd.f32 %v638_v6, %v288_v16  ;;  %v292_v34 = vmul.f32 %v628_v0, %v800_v4 }
  0x46   : > { %464 = vst [vmem:[%s689_s25 + $0xd0] sm:$0xff] %v400_v35  ;;  %v417_v20 = vmax.f32 %v353_v61, 0.0  ;;  %v357_v2 = vadd.f32 %v638_v6, %v289_v9  ;;  %v293_v47 = vmul.f32 %v628_v0, %v803_v5  ;;  %v418_v22 = vmax.f32 %v354_v62, 0.0  ;;  %v1100_v35 = vld [vmem:[#allocation2_spill] sm:$0xff] }
  0x47   : > { %465 = vst [vmem:[%s689_s25 + $0xd8] sm:$0xff] %v401_v24  ;;  %v358_v3 = vadd.f32 %v638_v6, %v290_v45  ;;  %v294_v48 = vmul.f32 %v628_v0, %v1100_v35  ;;  %v419_v23 = vmax.f32 %v355_v63, 0.0  ;;  %v359_v4 = vadd.f32 %v638_v6, %v291_v19  ;;  %v1101_v24 = vld [vmem:[#allocation3_spill] sm:$0xff] }
  0x48   : > { %466 = vst [vmem:[%s689_s25 + $0xe0] sm:$0xff] %v402_v25  ;;  %v295_v49 = vmul.f32 %v628_v0, %v1101_v24  ;;  %v420_v36 = vmax.f32 %v356_v1, 0.0  ;;  %v360_v5 = vadd.f32 %v638_v6, %v292_v34  ;;  %v1102_v25 = vld [vmem:[#allocation4_spill] sm:$0xff]  ;;  %v421_v14 = vmax.f32 %v357_v2, 0.0 }
  0x49   : > { %467 = vst [vmem:[%s689_s25 + $0xe8] sm:$0xff] %v403_v51  ;;  %v296_v50 = vmul.f32 %v628_v0, %v1102_v25  ;;  %v361_v37 = vadd.f32 %v638_v6, %v293_v47  ;;  %v1103_v51 = vld [vmem:[#allocation5_spill] sm:$0xff]  ;;  %v422_v29 = vmax.f32 %v358_v3, 0.0  ;;  %v298_v30 = vmul.f32 %v628_v0, %v1104_v38 }
  0x4a   : > { %468 = vst [vmem:[%s689_s25 + $0xf0] sm:$0xff] %v404_v52  ;;  %v297_v21 = vmul.f32 %v628_v0, %v1103_v51  ;;  %v362_v52 = vadd.f32 %v638_v6, %v294_v48  ;;  %v363_v26 = vadd.f32 %v638_v6, %v295_v49  ;;  %v424_v13 = vmax.f32 %v360_v5, 0.0 }
  0x4b   : > { %469 = vst [vmem:[%s689_s25 + $0xf8] sm:$0xff] %v405_v18  ;;  %v423_v18 = vmax.f32 %v359_v4, 0.0  ;;  %v364_v15 = vadd.f32 %v638_v6, %v296_v50  ;;  %v425_v40 = vmax.f32 %v361_v37, 0.0  ;;  %v302_v57 = vmul.f32 %v628_v0, %v833_v7 }
  0x4c   : > { %470 = vst [vmem:[%s689_s25 + $0x100] sm:$0xff] %v406_v54  ;;  %v299_v54 = vmul.f32 %v628_v0, %v1105_v39  ;;  %v365_v27 = vadd.f32 %v638_v6, %v297_v21  ;;  %v426_v41 = vmax.f32 %v362_v52, 0.0  ;;  %v427_v31 = vmax.f32 %v363_v26, 0.0 }
  0x4d   : > { %471 = vst [vmem:[%s689_s25 + $0x108] sm:$0xff] %v407_v55  ;;  %v300_v55 = vmul.f32 %v628_v0, %v827_v28  ;;  %v428_v8 = vmax.f32 %v364_v15, 0.0  ;;  %v304_v43 = vmul.f32 %v628_v0, %v1108_v59  ;;  %v370_v16 = vadd.f32 %v638_v6, %v302_v57 }
  0x4e   : > { %472 = vst [vmem:[%s689_s25 + $0x110] sm:$0xff] %v408_v10  ;;  %v1106_v10 = vld [vmem:[#allocation8_spill] sm:$0xff]  ;;  %v367_v28 = vadd.f32 %v638_v6, %v299_v54  ;;  %v429_v7 = vmax.f32 %v365_v27, 0.0  ;;  %v437_v63 = vmax.f32 %v967_v53, 0.0 }
  0x4f   : > { %473 = vst [vmem:[%s689_s25 + $0x118] sm:$0xff] %v409_v11  ;;  %v301_v56 = vmul.f32 %v628_v0, %v1106_v10  ;;  %v366_v11 = vadd.f32 %v638_v6, %v298_v30  ;;  %v372_v9 = vadd.f32 %v638_v6, %v304_v43  ;;  %v434_v62 = vmax.f32 %v370_v16, 0.0 }
  0x50   : > { %474 = vst [vmem:[%s689_s25 + $0x120] sm:$0xff] %v410_v42  ;;  %v1107_v42 = vld [vmem:[#allocation9_spill] sm:$0xff] }
  0x51   : > { %475 = vst [vmem:[%s689_s25 + $0x128] sm:$0xff] %v411_v12  ;;  %v303_v58 = vmul.f32 %v628_v0, %v1107_v42  ;;  %v368_v12 = vadd.f32 %v638_v6, %v300_v55  ;;  %v430_v60 = vmax.f32 %v366_v11, 0.0 }
  0x52   : > { %476 = vst [vmem:[%s689_s25 + $0x130] sm:$0xff] %v412_v32  ;;  %v369_v32 = vadd.f32 %v638_v6, %v301_v56 }
  0x53   : > { %477 = vst [vmem:[%s689_s25 + $0x138] sm:$0xff] %v413_v44  ;;  %v431_v44 = vmax.f32 %v367_v28, 0.0  ;;  %v371_v61 = vadd.f32 %v638_v6, %v303_v58  ;;  %v432_v0 = vmax.f32 %v368_v12, 0.0 }
  0x54   : > { %478 = vst [vmem:[%s689_s25 + $0x140] sm:$0xff] %v414_v33  ;;  %v433_v33 = vmax.f32 %v369_v32, 0.0 }
  0x55   : > { %479 = vst [vmem:[%s689_s25 + $0x148] sm:$0xff] %v415_v17  ;;  %v435_v45 = vmax.f32 %v371_v61, 0.0  ;;  %v436_v17 = vmax.f32 %v372_v9, 0.0 }
  0x56   : > { %480 = vst [vmem:[%s689_s25 + $0x150] sm:$0xff] %v416_v46 }
  0x57   : > { %481 = vst [vmem:[%s689_s25 + $0x158] sm:$0xff] %v417_v20 }
  0x58   : > { %482 = vst [vmem:[%s689_s25 + $0x160] sm:$0xff] %v418_v22 }
  0x59   : > { %483 = vst [vmem:[%s689_s25 + $0x168] sm:$0xff] %v419_v23 }
  0x5a   : > { %484 = vst [vmem:[%s689_s25 + $0x170] sm:$0xff] %v420_v36 }
  0x5b   : > { %485 = vst [vmem:[%s689_s25 + $0x178] sm:$0xff] %v421_v14 }
  0x5c   : > { %486 = vst [vmem:[%s689_s25 + $0x180] sm:$0xff] %v422_v29 }
  0x5d   : > { %487 = vst [vmem:[%s689_s25 + $0x188] sm:$0xff] %v423_v18 }
  0x5e   : > { %488 = vst [vmem:[%s689_s25 + $0x190] sm:$0xff] %v424_v13 }
  0x5f   : > { %489 = vst [vmem:[%s689_s25 + $0x198] sm:$0xff] %v425_v40 }
  0x60   : > { %490 = vst [vmem:[%s689_s25 + $0x1a0] sm:$0xff] %v426_v41 }
  0x61   : > { %491 = vst [vmem:[%s689_s25 + $0x1a8] sm:$0xff] %v427_v31 }
  0x62   : > { %492 = vst [vmem:[%s689_s25 + $0x1b0] sm:$0xff] %v428_v8 }
  0x63   : > { %493 = vst [vmem:[%s689_s25 + $0x1b8] sm:$0xff] %v429_v7 }
  0x64   : > { %494 = vst [vmem:[%s689_s25 + $0x1c0] sm:$0xff] %v430_v60 }
  0x65   : > { %495 = vst [vmem:[%s689_s25 + $0x1c8] sm:$0xff] %v431_v44 }
  0x66   : > { %496 = vst [vmem:[%s689_s25 + $0x1d0] sm:$0xff] %v432_v0 }
  0x67   : > { %497 = vst [vmem:[%s689_s25 + $0x1d8] sm:$0xff] %v433_v33 }
  0x68   : > { %498 = vst [vmem:[%s689_s25 + $0x1e0] sm:$0xff] %v434_v62 }
  0x69   : > { %499 = vst [vmem:[%s689_s25 + $0x1e8] sm:$0xff] %v435_v45 }
  0x6a   : > { %500 = vst [vmem:[%s689_s25 + $0x1f0] sm:$0xff] %v436_v17 }
  0x6b   : > { %501 = vst [vmem:[%s689_s25 + $0x1f8] sm:$0xff] %v437_v63 }
  0x6c PF: > { %s13_s12 = sadd.s32 1, %s585_s12  }
  0x6d   : > { %p10_p4 = scmp.ge.s32.totalorder %s13_s12, 4  }
  0x6f   :  { %12 = sbr.rel (!%p10_p4) target bundleno = 1 (0x1), region = 62 }

// kernel: unit3d_forward.2
= control target key start
LH: loop header
LB: loop body
LE: loop exit
PB: predicated region body
PF: predicated region fallthrough
CT: control target
= control target key end

     0   :  { %s1807_s15 = smov 0   ;;  %s1809_s16 = smov 0   ;;  %s2267_s0 = inlined_call_operand.vmem [shape: bf16[1024,128], index: 0, kind: input, shape index: {}]   ;;  %s2268_s1 = inlined_call_operand.vmem [shape: bf16[128,128], index: 1, kind: input, shape index: {}]   ;;  %s2269_s2 = inlined_call_operand.vmem [shape: f32[1024,128], index: 2, kind: output, shape index: {0}]   ;;  %s2270_s3 = inlined_call_operand.vmem [shape: f32[16,128], index: 3, kind: output, shape index: {1}]   ;;  %s2271_s4 = inlined_call_operand.vmem [shape: f32[16,128], index: 4, kind: output, shape index: {2}]  }
   0x1   :  { %s1811_s17 = smov 0  }
   0x2 LB: > { %s27_s18 = sadd.s32 1, %s1776_s16  ;;  %p1501_p0 = scmp.ge.s32.totalorder %s1780_s17, 1  ;;  %s1780_s17 = sphi %s1811_s17, %s15_s17   ;;  %s1776_s16 = sphi %s1809_s16, %s2273_s16   ;;  %s1772_s15 = sphi %s1807_s15, %s2272_s15  }
   0x3   : > { %p29_p1 = scmp.ge.s32.totalorder %s27_s18, 2  ;;  %p196_p2 = scmp.lt.s32.totalorder %s1780_s17, 3 }
   0x5   : > { %s2275_s18 = smov (%p29_p1, %s27_s18), 0  ;;  %p197_p3 = pnand %p1501_p0, %p196_p2 }
   0x6   : > { %s1502_s27 = sshll.u32 (!%p197_p3), %s1772_s15, 6  ;;  %p259_p5 = scmp.lt.s32.totalorder (!%p197_p3), %s1772_s15, 1 }
   0x7   : > { %200 = sbr.rel (%p197_p3) target bundleno = 403 (0x193), region = 28  ;;  %p239_p4 = scmp.lt.s32.totalorder (!%p197_p3), %s1502_s27, 127 }
   0xc   : > { %v1709_v0 = vld [vmem:[%s2268_s1 + $0x38] sm:$0xff]  ;;  %v1708_v1 = vld [vmem:[%s2268_s1 + $0x30] sm:$0xff]  ;;  %v1707_v2 = vld [vmem:[%s2268_s1 + $0x28] sm:$0xff]  ;;  %s2277_s27 = smov (!%p239_p4, %s1502_s27), 127  ;;  %s2279_s15 = smov (!%p259_p5, %s1772_s15), 1 }
   0xd   : > { %719 = vmatpush.bf16.msra.mxu0 %v1709_v0  ;;  %1710 = vmatpush.bf16.msra.mxu1 %v1709_v0  ;;  %v1706_v3 = vld [vmem:[%s2268_s1 + $0x20] sm:$0xff]  ;;  %v1705_v4 = vld [vmem:[%s2268_s1 + $0x18] sm:$0xff]  ;;  %v1704_v5 = vld [vmem:[%s2268_s1 + $0x10] sm:$0xff]  ;;  %s1503_s8 = sshll.u32 %s2277_s27, 2  ;;  %s1505_s14 = sshll.u32 %s2277_s27, 3 }
   0xe   : > { %1711 = vmatpush.bf16.msra.mxu2 %v1709_v0  ;;  %1712 = vmatpush.bf16.msra.mxu3 %v1709_v0  ;;  %v1703_v6 = vld [vmem:[%s2268_s1 + $0x8] sm:$0xff]  ;;  %v1702_v7 = vld [vmem:[%s2268_s1] sm:$0xff]  ;;  %s1858_s13 = scalar_lea.vmem %s2267_s0, %s1503_s8  ;;  %s1892_s21 = scalar_lea.vmem %s2269_s2, %s1505_s14 }
   0xf   : > { %v1670_v8 = vld [vmem:[%s1858_s13] sm:$0xff]  ;;  %v1671_v10 = vld [vmem:[%s1858_s13 + $0x8] sm:$0xff]  ;;  %v1672_v13 = vld [vmem:[%s1858_s13 + $0x10] sm:$0xff]  ;;  %s1506_s22 = sshll.u32 %s2279_s15, 3 }
  0x10   : > { %v1678_v9 = vld [vmem:[%s1858_s13 + $0x40] sm:$0xff]  ;;  %v1679_v11 = vld [vmem:[%s1858_s13 + $0x48] sm:$0xff]  ;;  %v1680_v14 = vld [vmem:[%s1858_s13 + $0x50] sm:$0xff]  ;;  %s262_s25 = scalar_lea.vmem %s2270_s3, %s1506_s22  ;;  %s266_s28 = scalar_lea.vmem %s2271_s4, %s1506_s22 }
  0x11   : > { %720 = vmatpush.bf16.msra.mxu0 %v1708_v1  ;;  %1713 = vmatpush.bf16.msra.mxu1 %v1708_v1  ;;  %v1686_v12 = vld [vmem:[%s1858_s13 + $0x80] sm:$0xff]  ;;  %v1687_v15 = vld [vmem:[%s1858_s13 + $0x88] sm:$0xff]  ;;  %v1673_v16 = vld [vmem:[%s1858_s13 + $0x18] sm:$0xff] }
  0x12   : > { %1714 = vmatpush.bf16.msra.mxu2 %v1708_v1  ;;  %1715 = vmatpush.bf16.msra.mxu3 %v1708_v1  ;;  %v1681_v17 = vld [vmem:[%s1858_s13 + $0x58] sm:$0xff]  ;;  %v1688_v18 = vld [vmem:[%s1858_s13 + $0x90] sm:$0xff]  ;;  %v1694_v19 = vld [vmem:[%s1858_s13 + $0xc0] sm:$0xff] }
  0x13   : > { %v1674_v20 = vld [vmem:[%s1858_s13 + $0x20] sm:$0xff]  ;;  %v1689_v22 = vld [vmem:[%s1858_s13 + $0x98] sm:$0xff]  ;;  %v1695_v23 = vld [vmem:[%s1858_s13 + $0xc8] sm:$0xff] }
  0x14   : > { %v1682_v21 = vld [vmem:[%s1858_s13 + $0x60] sm:$0xff]  ;;  %v1675_v24 = vld [vmem:[%s1858_s13 + $0x28] sm:$0xff]  ;;  %v1696_v27 = vld [vmem:[%s1858_s13 + $0xd0] sm:$0xff] }
  0x15   : > { %721 = vmatpush.bf16.msra.mxu0 %v1707_v2  ;;  %1716 = vmatpush.bf16.msra.mxu1 %v1707_v2  ;;  %v1683_v25 = vld [vmem:[%s1858_s13 + $0x68] sm:$0xff]  ;;  %v1690_v26 = vld [vmem:[%s1858_s13 + $0xa0] sm:$0xff]  ;;  %v1676_v28 = vld [vmem:[%s1858_s13 + $0x30] sm:$0xff] }
  0x16   : > { %1717 = vmatpush.bf16.msra.mxu2 %v1707_v2  ;;  %1718 = vmatpush.bf16.msra.mxu3 %v1707_v2  ;;  %v1684_v29 = vld [vmem:[%s1858_s13 + $0x70] sm:$0xff]  ;;  %v1691_v30 = vld [vmem:[%s1858_s13 + $0xa8] sm:$0xff]  ;;  %v1697_v31 = vld [vmem:[%s1858_s13 + $0xd8] sm:$0xff] }
  0x17   : > { %v1677_v32 = vld [vmem:[%s1858_s13 + $0x38] sm:$0xff]  ;;  %v1692_v34 = vld [vmem:[%s1858_s13 + $0xb0] sm:$0xff]  ;;  %v1698_v35 = vld [vmem:[%s1858_s13 + $0xe0] sm:$0xff] }
  0x18   : > { %v1685_v33 = vld [vmem:[%s1858_s13 + $0x78] sm:$0xff]  ;;  %v1699_v39 = vld [vmem:[%s1858_s13 + $0xe8] sm:$0xff]  ;;  %v1700_v51 = vld [vmem:[%s1858_s13 + $0xf0] sm:$0xff] }
  0x19   : > { %722 = vmatpush.bf16.msra.mxu0 %v1706_v3  ;;  %1719 = vmatpush.bf16.msra.mxu1 %v1706_v3  ;;  %v1693_v38 = vld [vmem:[%s1858_s13 + $0xb8] sm:$0xff] }
  0x1a   : > { %1720 = vmatpush.bf16.msra.mxu2 %v1706_v3  ;;  %1721 = vmatpush.bf16.msra.mxu3 %v1706_v3  ;;  %v1701_v0 = vld [vmem:[%s1858_s13 + $0xf8] sm:$0xff] }
  0x1d   : > { %723 = vmatpush.bf16.msra.mxu0 %v1705_v4  ;;  %1722 = vmatpush.bf16.msra.mxu1 %v1705_v4 }
  0x1e   : > { %1723 = vmatpush.bf16.msra.mxu2 %v1705_v4  ;;  %1724 = vmatpush.bf16.msra.mxu3 %v1705_v4 }
  0x21   : > { %724 = vmatpush.bf16.msra.mxu0 %v1704_v5  ;;  %1725 = vmatpush.bf16.msra.mxu1 %v1704_v5 }
  0x22   : > { %1726 = vmatpush.bf16.msra.mxu2 %v1704_v5  ;;  %1727 = vmatpush.bf16.msra.mxu3 %v1704_v5 }
  0x25   : > { %725 = vmatpush.bf16.msra.mxu0 %v1703_v6  ;;  %1728 = vmatpush.bf16.msra.mxu1 %v1703_v6 }
  0x26   : > { %1729 = vmatpush.bf16.msra.mxu2 %v1703_v6  ;;  %1730 = vmatpush.bf16.msra.mxu3 %v1703_v6 }
  0x29   : > { %726 = vmatpush.bf16.msra.mxu0 %v1702_v7  ;;  %1731 = vmatpush.bf16.msra.mxu1 %v1702_v7 }
  0x2a   : > { %1732 = vmatpush.bf16.msra.mxu2 %v1702_v7  ;;  %1733 = vmatpush.bf16.msra.mxu3 %v1702_v7 }
  0x2c   : > { %727 = vmatmul.bf16.vlgmr.msra.gmra.mxu0 %v1670_v8  ;;  %767 = vmatmul.bf16.vlgmr.msra.gmra.mxu1 %v1678_v9 }
  0x2d   : > { %807 = vmatmul.bf16.vlgmr.msra.gmra.mxu2 %v1686_v12  ;;  %847 = vmatmul.bf16.vlgmr.msra.gmra.mxu3 %v1694_v19 }
  0x3c   : > { %732 = vmatmul.bf16.gmra.mxu0 %v1671_v10  ;;  %772 = vmatmul.bf16.gmra.mxu1 %v1679_v11 }
  0x3d   : > { %812 = vmatmul.bf16.gmra.mxu2 %v1687_v15  ;;  %852 = vmatmul.bf16.gmra.mxu3 %v1695_v23 }
  0x4c   : > { %737 = vmatmul.bf16.gmra.mxu0 %v1672_v13  ;;  %777 = vmatmul.bf16.gmra.mxu1 %v1680_v14 }
  0x4d   : > { %817 = vmatmul.bf16.gmra.mxu2 %v1688_v18  ;;  %857 = vmatmul.bf16.gmra.mxu3 %v1696_v27 }
  0x5c   : > { %742 = vmatmul.bf16.gmra.mxu0 %v1673_v16  ;;  %782 = vmatmul.bf16.gmra.mxu1 %v1681_v17 }
  0x5d   : > { %822 = vmatmul.bf16.gmra.mxu2 %v1689_v22  ;;  %862 = vmatmul.bf16.gmra.mxu3 %v1697_v31 }
  0x6c   : > { %747 = vmatmul.bf16.gmra.mxu0 %v1674_v20  ;;  %787 = vmatmul.bf16.gmra.mxu1 %v1682_v21 }
  0x6d   : > { %827 = vmatmul.bf16.gmra.mxu2 %v1690_v26  ;;  %867 = vmatmul.bf16.gmra.mxu3 %v1698_v35 }
  0x7c   : > { %752 = vmatmul.bf16.gmra.mxu0 %v1675_v24  ;;  %792 = vmatmul.bf16.gmra.mxu1 %v1683_v25 }
  0x7d   : > { %832 = vmatmul.bf16.gmra.mxu2 %v1691_v30  ;;  %872 = vmatmul.bf16.gmra.mxu3 %v1699_v39 }
  0x8c   : > { %757 = vmatmul.bf16.gmra.mxu0 %v1676_v28  ;;  %797 = vmatmul.bf16.gmra.mxu1 %v1684_v29 }
  0x8d   : > { %837 = vmatmul.bf16.gmra.mxu2 %v1692_v34  ;;  %877 = vmatmul.bf16.gmra.mxu3 %v1700_v51 }
  0x9c   : > { %762 = vmatmul.bf16.gmra.mxu0 %v1677_v32  ;;  %802 = vmatmul.bf16.gmra.mxu1 %v1685_v33 }
  0x9d   : > { %842 = vmatmul.bf16.gmra.mxu2 %v1693_v38  ;;  %882 = vmatmul.bf16.gmra.mxu3 %v1701_v0 }
  0xa9   : > { %v728_v36 = vpop.f32.mrf.mxu0  ;;  %v1894_v37 = vpop.f32.mrf.mxu1 }
  0xaa   : > { %1083 = vst [vmem:[%s1892_s21] sm:$0xff] %v728_v36  ;;  %v1216_v42 = vmul.f32 %v728_v36, %v728_v36 }
  0xab   : > { %1099 = vst [vmem:[%s1892_s21 + $0x80] sm:$0xff] %v1894_v37 }
  0xb0   : > { %v1915_v56 = vpop.f32.mrf.mxu2  ;;  %v1958_v10 = vpop.f32.mrf.mxu3 }
  0xb1   : > { %v730_v40 = vpop.f32.mrf.mxu0  ;;  %v1901_v41 = vpop.f32.mrf.mxu1  ;;  %1115 = vst [vmem:[%s1892_s21 + $0x100] sm:$0xff] %v1915_v56 }
  0xb2   : > { %1084 = vst [vmem:[%s1892_s21 + $0x8] sm:$0xff] %v730_v40  ;;  %v1147_v43 = vadd.f32 %v730_v40, %v728_v36  ;;  %v1217_v44 = vmul.f32 %v730_v40, %v730_v40 }
  0xb3   : > { %1100 = vst [vmem:[%s1892_s21 + $0x88] sm:$0xff] %v1901_v41 }
  0xb4   : > { %v1280_v45 = vadd.f32 %v1217_v44, %v1216_v42  ;;  %1131 = vst [vmem:[%s1892_s21 + $0x180] sm:$0xff] %v1958_v10 }
  0xb8   : > { %v1926_v62 = vpop.f32.mrf.mxu2  ;;  %v1971_v14 = vpop.f32.mrf.mxu3 }
  0xb9   : > { %v733_v46 = vpop.f32.mrf.mxu0  ;;  %v1906_v47 = vpop.f32.mrf.mxu1  ;;  %1116 = vst [vmem:[%s1892_s21 + $0x108] sm:$0xff] %v1926_v62 }
  0xba   : > { %1085 = vst [vmem:[%s1892_s21 + $0x10] sm:$0xff] %v733_v46  ;;  %v1148_v48 = vadd.f32 %v1147_v43, %v733_v46  ;;  %v1218_v49 = vmul.f32 %v733_v46, %v733_v46 }
  0xbb   : > { %1101 = vst [vmem:[%s1892_s21 + $0x90] sm:$0xff] %v1906_v47 }
  0xbc   : > { %v1281_v50 = vadd.f32 %v1280_v45, %v1218_v49  ;;  %1132 = vst [vmem:[%s1892_s21 + $0x188] sm:$0xff] %v1971_v14 }
  0xc0   : > { %v1938_v3 = vpop.f32.mrf.mxu2  ;;  %v1984_v18 = vpop.f32.mrf.mxu3 }
  0xc1   : > { %v735_v52 = vpop.f32.mrf.mxu0  ;;  %v1912_v53 = vpop.f32.mrf.mxu1  ;;  %1117 = vst [vmem:[%s1892_s21 + $0x110] sm:$0xff] %v1938_v3 }
  0xc2   : > { %1086 = vst [vmem:[%s1892_s21 + $0x18] sm:$0xff] %v735_v52  ;;  %v1149_v54 = vadd.f32 %v1148_v48, %v735_v52  ;;  %v1219_v55 = vmul.f32 %v735_v52, %v735_v52 }
  0xc3   : > { %1102 = vst [vmem:[%s1892_s21 + $0x98] sm:$0xff] %v1912_v53 }
  0xc4   : > { %v1282_v57 = vadd.f32 %v1281_v50, %v1219_v55  ;;  %1133 = vst [vmem:[%s1892_s21 + $0x190] sm:$0xff] %v1984_v18 }
  0xc8   : > { %v1947_v6 = vpop.f32.mrf.mxu2  ;;  %v1997_v22 = vpop.f32.mrf.mxu3 }
  0xc9   : > { %v738_v58 = vpop.f32.mrf.mxu0  ;;  %v1921_v59 = vpop.f32.mrf.mxu1  ;;  %1118 = vst [vmem:[%s1892_s21 + $0x118] sm:$0xff] %v1947_v6 }
  0xca   : > { %1087 = vst [vmem:[%s1892_s21 + $0x20] sm:$0xff] %v738_v58  ;;  %v1924_v60 = vadd.f32 %v1149_v54, %v738_v58  ;;  %v1220_v61 = vmul.f32 %v738_v58, %v738_v58 }
  0xcb   : > { %1103 = vst [vmem:[%s1892_s21 + $0xa0] sm:$0xff] %v1921_v59 }
  0xcc   : > { %v1930_v63 = vadd.f32 %v1282_v57, %v1220_v61  ;;  %1134 = vst [vmem:[%s1892_s21 + $0x198] sm:$0xff] %v1997_v22 }
  0xd0   : > { %v1956_v9 = vpop.f32.mrf.mxu2  ;;  %v2010_v26 = vpop.f32.mrf.mxu3 }
  0xd1   : > { %v740_v1 = vpop.f32.mrf.mxu0  ;;  %v1935_v2 = vpop.f32.mrf.mxu1  ;;  %1119 = vst [vmem:[%s1892_s21 + $0x120] sm:$0xff] %v1956_v9 }
  0xd2   : > { %1088 = vst [vmem:[%s1892_s21 + $0x28] sm:$0xff] %v740_v1  ;;  %v1221_v31 = vmul.f32 %v740_v1, %v740_v1  ;;  %v1151_v32 = vadd.f32 %v1924_v60, %v740_v1 }
  0xd3   : > { %1104 = vst [vmem:[%s1892_s21 + $0xa8] sm:$0xff] %v1935_v2 }
  0xd4   : > { %1135 = vst [vmem:[%s1892_s21 + $0x1a0] sm:$0xff] %v2010_v26  ;;  %v1284_v34 = vadd.f32 %v1930_v63, %v1221_v31 }
  0xd8   : > { %v1969_v13 = vpop.f32.mrf.mxu2  ;;  %v2023_v30 = vpop.f32.mrf.mxu3 }
  0xd9   : > { %v743_v4 = vpop.f32.mrf.mxu0  ;;  %v1944_v5 = vpop.f32.mrf.mxu1  ;;  %1120 = vst [vmem:[%s1892_s21 + $0x128] sm:$0xff] %v1969_v13 }
  0xda   : > { %1089 = vst [vmem:[%s1892_s21 + $0x30] sm:$0xff] %v743_v4  ;;  %v1222_v33 = vmul.f32 %v743_v4, %v743_v4  ;;  %v1152_v35 = vadd.f32 %v1151_v32, %v743_v4 }
  0xdb   : > { %1105 = vst [vmem:[%s1892_s21 + $0xb0] sm:$0xff] %v1944_v5 }
  0xdc   : > { %1136 = vst [vmem:[%s1892_s21 + $0x1a8] sm:$0xff] %v2023_v30  ;;  %v1285_v40 = vadd.f32 %v1284_v34, %v1222_v33 }
  0xe0   : > { %v1982_v17 = vpop.f32.mrf.mxu2  ;;  %v2038_v45 = vpop.f32.mrf.mxu3 }
  0xe1   : > { %v745_v7 = vpop.f32.mrf.mxu0  ;;  %v1953_v8 = vpop.f32.mrf.mxu1  ;;  %1121 = vst [vmem:[%s1892_s21 + $0x130] sm:$0xff] %v1982_v17 }
  0xe2   : > { %1090 = vst [vmem:[%s1892_s21 + $0x38] sm:$0xff] %v745_v7  ;;  %v1223_v36 = vmul.f32 %v745_v7, %v745_v7  ;;  %v1153_v42 = vadd.f32 %v1152_v35, %v745_v7 }
  0xe3   : > { %1106 = vst [vmem:[%s1892_s21 + $0xb8] sm:$0xff] %v1953_v8 }
  0xe4   : > { %v1286_v46 = vadd.f32 %v1285_v40, %v1223_v36  ;;  %1137 = vst [vmem:[%s1892_s21 + $0x1b0] sm:$0xff] %v2038_v45 }
  0xe8   : > { %v1995_v21 = vpop.f32.mrf.mxu2  ;;  %v2051_v4 = vpop.f32.mrf.mxu3 }
  0xe9   : > { %v748_v11 = vpop.f32.mrf.mxu0  ;;  %v1966_v12 = vpop.f32.mrf.mxu1  ;;  %1122 = vst [vmem:[%s1892_s21 + $0x138] sm:$0xff] %v1995_v21 }
  0xea   : > { %1091 = vst [vmem:[%s1892_s21 + $0x40] sm:$0xff] %v748_v11  ;;  %v1224_v43 = vmul.f32 %v748_v11, %v748_v11  ;;  %v1154_v48 = vadd.f32 %v1153_v42, %v748_v11 }
  0xeb   : > { %1107 = vst [vmem:[%s1892_s21 + $0xc0] sm:$0xff] %v1966_v12 }
  0xec   : > { %v1287_v50 = vadd.f32 %v1286_v46, %v1224_v43  ;;  %1138 = vst [vmem:[%s1892_s21 + $0x1b8] sm:$0xff] %v2051_v4 }
  0xf0   : > { %v2008_v25 = vpop.f32.mrf.mxu2  ;;  %v2064_v43 = vpop.f32.mrf.mxu3 }
  0xf1   : > { %v750_v15 = vpop.f32.mrf.mxu0  ;;  %v1979_v16 = vpop.f32.mrf.mxu1  ;;  %1123 = vst [vmem:[%s1892_s21 + $0x140] sm:$0xff] %v2008_v25 }
  0xf2   : > { %1092 = vst [vmem:[%s1892_s21 + $0x48] sm:$0xff] %v750_v15  ;;  %v1225_v49 = vmul.f32 %v750_v15, %v750_v15  ;;  %v1155_v51 = vadd.f32 %v1154_v48, %v750_v15 }
  0xf3   : > { %1108 = vst [vmem:[%s1892_s21 + $0xc8] sm:$0xff] %v1979_v16 }
  0xf4   : > { %v1288_v54 = vadd.f32 %v1287_v50, %v1225_v49  ;;  %1139 = vst [vmem:[%s1892_s21 + $0x1c0] sm:$0xff] %v2064_v43  ;;  %v1233_v49 = vmul.f32 %v1901_v41, %v1901_v41 }
  0xf8   : > { %v2021_v29 = vpop.f32.mrf.mxu2 }
  0xf9   : > { %v753_v19 = vpop.f32.mrf.mxu0  ;;  %v1992_v20 = vpop.f32.mrf.mxu1  ;;  %1124 = vst [vmem:[%s1892_s21 + $0x148] sm:$0xff] %v2021_v29 }
  0xfa   : > { %1093 = vst [vmem:[%s1892_s21 + $0x50] sm:$0xff] %v753_v19  ;;  %v1226_v52 = vmul.f32 %v753_v19, %v753_v19  ;;  %v1156_v55 = vadd.f32 %v1155_v51, %v753_v19 }
  0xfb   : > { %1109 = vst [vmem:[%s1892_s21 + $0xd0] sm:$0xff] %v1992_v20 }
  0xfc   : > { %v1289_v61 = vadd.f32 %v1288_v54, %v1226_v52  ;;  %v1234_v52 = vmul.f32 %v1906_v47, %v1906_v47 }
 0x100   : > { %v2036_v44 = vpop.f32.mrf.mxu2 }
 0x101   : > { %v755_v23 = vpop.f32.mrf.mxu0  ;;  %v2005_v24 = vpop.f32.mrf.mxu1  ;;  %1125 = vst [vmem:[%s1892_s21 + $0x150] sm:$0xff] %v2036_v44 }
 0x102   : > { %1094 = vst [vmem:[%s1892_s21 + $0x58] sm:$0xff] %v755_v23  ;;  %v1227_v57 = vmul.f32 %v755_v23, %v755_v23  ;;  %v1157_v63 = vadd.f32 %v1156_v55, %v755_v23 }
 0x103   : > { %1110 = vst [vmem:[%s1892_s21 + $0xd8] sm:$0xff] %v2005_v24 }
 0x104   : > { %v1290_v7 = vadd.f32 %v1289_v61, %v1227_v57 }
 0x108   : > { %v2049_v1 = vpop.f32.mrf.mxu2 }
 0x109   : > { %v758_v27 = vpop.f32.mrf.mxu0  ;;  %v2018_v28 = vpop.f32.mrf.mxu1  ;;  %1126 = vst [vmem:[%s1892_s21 + $0x158] sm:$0xff] %v2049_v1 }
 0x10a   : > { %1095 = vst [vmem:[%s1892_s21 + $0x60] sm:$0xff] %v758_v27  ;;  %v1228_v0 = vmul.f32 %v758_v27, %v758_v27  ;;  %v1158_v11 = vadd.f32 %v1157_v63, %v758_v27  ;;  %v2086_v63 = vpop.f32.mrf.mxu3 }
 0x10b   : > { %1111 = vst [vmem:[%s1892_s21 + $0xe0] sm:$0xff] %v2018_v28 }
 0x10c   : > { %v1291_v19 = vadd.f32 %v1290_v7, %v1228_v0  ;;  %1140 = vst [vmem:[%s1892_s21 + $0x1c8] sm:$0xff] %v2086_v63 }
 0x110   : > { %v2062_v42 = vpop.f32.mrf.mxu2 }
 0x111   : > { %v760_v38 = vpop.f32.mrf.mxu0  ;;  %v2033_v39 = vpop.f32.mrf.mxu1  ;;  %1127 = vst [vmem:[%s1892_s21 + $0x160] sm:$0xff] %v2062_v42 }
 0x112   : > { %1096 = vst [vmem:[%s1892_s21 + $0x68] sm:$0xff] %v760_v38  ;;  %v1229_v15 = vmul.f32 %v760_v38, %v760_v38  ;;  %v1159_v31 = vadd.f32 %v1158_v11, %v760_v38  ;;  %v1232_v38 = vmul.f32 %v1894_v37, %v1894_v37 }
 0x113   : > { %1112 = vst [vmem:[%s1892_s21 + $0xe8] sm:$0xff] %v2033_v39 }
 0x114   : > { %v1292_v32 = vadd.f32 %v1291_v19, %v1229_v15  ;;  %v1238_v15 = vmul.f32 %v1944_v5, %v1944_v5 }
 0x118   : > { %v2084_v61 = vpop.f32.mrf.mxu2 }
 0x119   : > { %v763_v58 = vpop.f32.mrf.mxu0  ;;  %v2046_v60 = vpop.f32.mrf.mxu1  ;;  %1128 = vst [vmem:[%s1892_s21 + $0x168] sm:$0xff] %v2084_v61 }
 0x11a   : > { %1097 = vst [vmem:[%s1892_s21 + $0x70] sm:$0xff] %v763_v58  ;;  %v1230_v23 = vmul.f32 %v763_v58, %v763_v58  ;;  %v1160_v33 = vadd.f32 %v1159_v31, %v763_v58 }
 0x11b   : > { %1113 = vst [vmem:[%s1892_s21 + $0xf0] sm:$0xff] %v2046_v60 }
 0x11c   : > { %v1293_v36 = vadd.f32 %v1292_v32, %v1230_v23  ;;  %v1239_v23 = vmul.f32 %v1953_v8, %v1953_v8 }
 0x121   : > { %v765_v34 = vpop.f32.mrf.mxu0  ;;  %v2059_v35 = vpop.f32.mrf.mxu1 }
 0x122   : > { %1098 = vst [vmem:[%s1892_s21 + $0x78] sm:$0xff] %v765_v34  ;;  %v1161_v40 = vadd.f32 %v1160_v33, %v765_v34  ;;  %v1231_v27 = vmul.f32 %v765_v34, %v765_v34  ;;  %v2104_v33 = vpop.f32.mrf.mxu2  ;;  %v2106_v34 = vpop.f32.mrf.mxu3 }
 0x123   : > { %1114 = vst [vmem:[%s1892_s21 + $0xf8] sm:$0xff] %v2059_v35 }
 0x124   : > { %v1162_v46 = vadd.f32 %v1161_v40, %v1894_v37  ;;  %v1294_v48 = vadd.f32 %v1293_v36, %v1231_v27  ;;  %v1235_v37 = vmul.f32 %v1912_v53, %v1912_v53  ;;  %1129 = vst [vmem:[%s1892_s21 + $0x170] sm:$0xff] %v2104_v33 }
 0x125   : > { %1141 = vst [vmem:[%s1892_s21 + $0x1d0] sm:$0xff] %v2106_v34 }
 0x126   : > { %v1163_v50 = vadd.f32 %v1162_v46, %v1901_v41  ;;  %v1295_v51 = vadd.f32 %v1294_v48, %v1232_v38  ;;  %v1236_v41 = vmul.f32 %v1921_v59, %v1921_v59  ;;  %v1242_v38 = vmul.f32 %v1992_v20, %v1992_v20 }
 0x128   : > { %v1164_v54 = vadd.f32 %v1163_v50, %v1906_v47  ;;  %v1296_v55 = vadd.f32 %v1295_v51, %v1233_v49  ;;  %v1243_v49 = vmul.f32 %v2005_v24, %v2005_v24 }
 0x12a   : > { %v1165_v57 = vadd.f32 %v1164_v54, %v1912_v53  ;;  %v1297_v58 = vadd.f32 %v1296_v55, %v1234_v52  ;;  %v1237_v53 = vmul.f32 %v1935_v2, %v1935_v2  ;;  %v2124_v51 = vpop.f32.mrf.mxu2  ;;  %v2126_v52 = vpop.f32.mrf.mxu3  ;;  %v1244_v54 = vmul.f32 %v2018_v28, %v2018_v28 }
 0x12b   : > { %1130 = vst [vmem:[%s1892_s21 + $0x178] sm:$0xff] %v2124_v51 }
 0x12c   : > { %v1166_v0 = vadd.f32 %v1165_v57, %v1921_v59  ;;  %v1298_v47 = vadd.f32 %v1297_v58, %v1235_v37  ;;  %1142 = vst [vmem:[%s1892_s21 + $0x1d8] sm:$0xff] %v2126_v52 }
 0x12e   : > { %v1167_v7 = vadd.f32 %v1166_v0, %v1935_v2  ;;  %v1299_v11 = vadd.f32 %v1298_v47, %v1236_v41  ;;  %v1240_v2 = vmul.f32 %v1966_v12, %v1966_v12  ;;  %v1246_v41 = vmul.f32 %v2046_v60, %v2046_v60 }
 0x130   : > { %v1300_v19 = vadd.f32 %v1299_v11, %v1237_v53  ;;  %v1168_v31 = vadd.f32 %v1167_v7, %v1944_v5  ;;  %v1241_v5 = vmul.f32 %v1979_v16, %v1979_v16 }
 0x132   : > { %v1169_v59 = vadd.f32 %v1168_v31, %v1953_v8  ;;  %v1301_v32 = vadd.f32 %v1300_v19, %v1238_v15  ;;  %v2144_v53 = vpop.f32.mrf.mxu3 }
 0x133   : > { %1143 = vst [vmem:[%s1892_s21 + $0x1e0] sm:$0xff] %v2144_v53 }
 0x134   : > { %v1170_v36 = vadd.f32 %v1169_v59, %v1966_v12  ;;  %v1302_v40 = vadd.f32 %v1301_v32, %v1239_v23  ;;  %v1251_v59 = vmul.f32 %v1947_v6, %v1947_v6 }
 0x136   : > { %v1171_v8 = vadd.f32 %v1170_v36, %v1979_v16  ;;  %v1303_v27 = vadd.f32 %v1302_v40, %v1240_v2 }
 0x138   : > { %v1172_v46 = vadd.f32 %v1171_v8, %v1992_v20  ;;  %v1304_v48 = vadd.f32 %v1303_v27, %v1241_v5 }
 0x13a   : > { %v1173_v12 = vadd.f32 %v1172_v46, %v2005_v24  ;;  %v1305_v50 = vadd.f32 %v1304_v48, %v1242_v38  ;;  %v1245_v24 = vmul.f32 %v2033_v39, %v2033_v39  ;;  %v1255_v46 = vmul.f32 %v1995_v21, %v1995_v21 }
 0x13c   : > { %v1174_v16 = vadd.f32 %v1173_v12, %v2018_v28  ;;  %v1306_v20 = vadd.f32 %v1305_v50, %v1243_v49  ;;  %v1247_v28 = vmul.f32 %v2059_v35, %v2059_v35 }
 0x13e   : > { %v1307_v55 = vadd.f32 %v1306_v20, %v1244_v54  ;;  %v1175_v37 = vadd.f32 %v1174_v16, %v2033_v39  ;;  %v1248_v39 = vmul.f32 %v1915_v56, %v1915_v56 }
 0x140   : > { %v1308_v57 = vadd.f32 %v1307_v55, %v1245_v24  ;;  %v1176_v58 = vadd.f32 %v1175_v37, %v2046_v60  ;;  %v1249_v60 = vmul.f32 %v1926_v62, %v1926_v62  ;;  %v1259_v24 = vmul.f32 %v2049_v1, %v2049_v1 }
 0x142   : > { %v1309_v0 = vadd.f32 %v1308_v57, %v1246_v41  ;;  %v1177_v47 = vadd.f32 %v1176_v58, %v2059_v35  ;;  %v1250_v35 = vmul.f32 %v1938_v3, %v1938_v3 }
 0x144   : > { %v1178_v7 = vadd.f32 %v1177_v47, %v1915_v56  ;;  %v1310_v11 = vadd.f32 %v1309_v0, %v1247_v28  ;;  %v2160_v56 = vpop.f32.mrf.mxu3 }
 0x145   : > { %1144 = vst [vmem:[%s1892_s21 + $0x1e8] sm:$0xff] %v2160_v56 }
 0x146   : > { %v1179_v15 = vadd.f32 %v1178_v7, %v1926_v62  ;;  %v1311_v19 = vadd.f32 %v1310_v11, %v1248_v39  ;;  %v1252_v62 = vmul.f32 %v1956_v9, %v1956_v9 }
 0x148   : > { %v1180_v31 = vadd.f32 %v1179_v15, %v1938_v3  ;;  %v1312_v23 = vadd.f32 %v1311_v19, %v1249_v60  ;;  %v1253_v3 = vmul.f32 %v1969_v13, %v1969_v13  ;;  %v1263_v60 = vmul.f32 %v2124_v51, %v2124_v51 }
 0x14a   : > { %v1181_v32 = vadd.f32 %v1180_v31, %v1947_v6  ;;  %v1313_v2 = vadd.f32 %v1312_v23, %v1250_v35  ;;  %v1254_v6 = vmul.f32 %v1982_v17, %v1982_v17 }
 0x14c   : > { %v1182_v36 = vadd.f32 %v1181_v32, %v1956_v9  ;;  %v1314_v40 = vadd.f32 %v1313_v2, %v1251_v59  ;;  %v2176_v9 = vpop.f32.mrf.mxu3 }
 0x14d   : > { %1145 = vst [vmem:[%s1892_s21 + $0x1f0] sm:$0xff] %v2176_v9 }
 0x14e   : > { %v1183_v5 = vadd.f32 %v1182_v36, %v1969_v13  ;;  %v1315_v8 = vadd.f32 %v1314_v40, %v1252_v62  ;;  %v1256_v13 = vmul.f32 %v2008_v25, %v2008_v25 }
 0x150   : > { %v1316_v27 = vadd.f32 %v1315_v8, %v1253_v3  ;;  %v1184_v38 = vadd.f32 %v1183_v5, %v1982_v17  ;;  %v1257_v17 = vmul.f32 %v2021_v29, %v2021_v29 }
 0x152   : > { %v1185_v48 = vadd.f32 %v1184_v38, %v1995_v21  ;;  %v1317_v49 = vadd.f32 %v1316_v27, %v1254_v6  ;;  %v1258_v21 = vmul.f32 %v2036_v44, %v2036_v44 }
 0x154   : > { %v1186_v12 = vadd.f32 %v1185_v48, %v2008_v25  ;;  %v1318_v50 = vadd.f32 %v1317_v49, %v1255_v46  ;;  %v885_v25 = vpop.f32.mrf.mxu3 }
 0x155   : > { %1146 = vst [vmem:[%s1892_s21 + $0x1f8] sm:$0xff] %v885_v25 }
 0x156   : > { %v1187_v16 = vadd.f32 %v1186_v12, %v2021_v29  ;;  %v1319_v54 = vadd.f32 %v1318_v50, %v1256_v13  ;;  %v1260_v29 = vmul.f32 %v2062_v42, %v2062_v42  ;;  %v1275_v50 = vmul.f32 %v2126_v52, %v2126_v52 }
 0x158   : > { %v1188_v20 = vadd.f32 %v1187_v16, %v2036_v44  ;;  %v1320_v55 = vadd.f32 %v1319_v54, %v1257_v17  ;;  %v1261_v44 = vmul.f32 %v2084_v61, %v2084_v61 }
 0x15a   : > { %v1189_v37 = vadd.f32 %v1188_v20, %v2049_v1  ;;  %v1321_v57 = vadd.f32 %v1320_v55, %v1258_v21  ;;  %v1262_v1 = vmul.f32 %v2104_v33, %v2104_v33 }
 0x15c   : > { %v1322_v58 = vadd.f32 %v1321_v57, %v1259_v24  ;;  %v1190_v41 = vadd.f32 %v1189_v37, %v2062_v42  ;;  %v1264_v42 = vmul.f32 %v1958_v10, %v1958_v10  ;;  %v1279_v57 = vmul.f32 %v885_v25, %v885_v25 }
 0x15e   : > { %v1323_v0 = vadd.f32 %v1322_v58, %v1260_v29  ;;  %v1191_v47 = vadd.f32 %v1190_v41, %v2084_v61  ;;  %v1265_v61 = vmul.f32 %v1971_v14, %v1971_v14 }
 0x160   : > { %v1324_v28 = vadd.f32 %v1323_v0, %v1261_v44  ;;  %v1192_v39 = vadd.f32 %v1191_v47, %v2104_v33  ;;  %v1266_v33 = vmul.f32 %v1984_v18, %v1984_v18 }
 0x162   : > { %v1325_v7 = vadd.f32 %v1324_v28, %v1262_v1  ;;  %v1193_v11 = vadd.f32 %v1192_v39, %v2124_v51  ;;  %v1267_v51 = vmul.f32 %v1997_v22, %v1997_v22 }
 0x164   : > { %v1194_v15 = vadd.f32 %v1193_v11, %v1958_v10  ;;  %v1326_v19 = vadd.f32 %v1325_v7, %v1263_v60  ;;  %v1268_v10 = vmul.f32 %v2010_v26, %v2010_v26 }
 0x166   : > { %v1195_v35 = vadd.f32 %v1194_v15, %v1971_v14  ;;  %v1327_v31 = vadd.f32 %v1326_v19, %v1264_v42  ;;  %v1269_v14 = vmul.f32 %v2023_v30, %v2023_v30 }
 0x168   : > { %v1196_v23 = vadd.f32 %v1195_v35, %v1984_v18  ;;  %v1328_v59 = vadd.f32 %v1327_v31, %v1265_v61  ;;  %v1270_v18 = vmul.f32 %v2038_v45, %v2038_v45 }
 0x16a   : > { %v1197_v32 = vadd.f32 %v1196_v23, %v1997_v22  ;;  %v1329_v2 = vadd.f32 %v1328_v59, %v1266_v33  ;;  %v1271_v22 = vmul.f32 %v2051_v4, %v2051_v4 }
 0x16c   : > { %v1198_v62 = vadd.f32 %v1197_v32, %v2010_v26  ;;  %v1330_v36 = vadd.f32 %v1329_v2, %v1267_v51  ;;  %v1272_v26 = vmul.f32 %v2064_v43, %v2064_v43 }
 0x16e   : > { %v1199_v40 = vadd.f32 %v1198_v62, %v2023_v30  ;;  %v1331_v3 = vadd.f32 %v1330_v36, %v1268_v10  ;;  %v1273_v30 = vmul.f32 %v2086_v63, %v2086_v63 }
 0x170   : > { %v1332_v5 = vadd.f32 %v1331_v3, %v1269_v14  ;;  %v1200_v8 = vadd.f32 %v1199_v40, %v2038_v45  ;;  %v1274_v45 = vmul.f32 %v2106_v34, %v2106_v34 }
 0x172   : > { %v1201_v6 = vadd.f32 %v1200_v8, %v2051_v4  ;;  %v1333_v27 = vadd.f32 %v1332_v5, %v1270_v18 }
 0x174   : > { %v1202_v38 = vadd.f32 %v1201_v6, %v2064_v43  ;;  %v1334_v46 = vadd.f32 %v1333_v27, %v1271_v22 }
 0x176   : > { %v1203_v48 = vadd.f32 %v1202_v38, %v2086_v63  ;;  %v1335_v49 = vadd.f32 %v1334_v46, %v1272_v26  ;;  %v1276_v63 = vmul.f32 %v2144_v53, %v2144_v53 }
 0x178   : > { %v1204_v13 = vadd.f32 %v1203_v48, %v2106_v34  ;;  %v1336_v4 = vadd.f32 %v1335_v49, %v1273_v30  ;;  %v1277_v34 = vmul.f32 %v2160_v56, %v2160_v56 }
 0x17a   : > { %v1205_v12 = vadd.f32 %v1204_v13, %v2126_v52  ;;  %v1337_v43 = vadd.f32 %v1336_v4, %v1274_v45  ;;  %v1278_v52 = vmul.f32 %v2176_v9, %v2176_v9 }
 0x17c   : > { %v1338_v17 = vadd.f32 %v1337_v43, %v1275_v50  ;;  %v1206_v16 = vadd.f32 %v1205_v12, %v2144_v53 }
 0x17e   : > { %v1339_v54 = vadd.f32 %v1338_v17, %v1276_v63  ;;  %v1207_v21 = vadd.f32 %v1206_v16, %v2160_v56 }
 0x180   : > { %v1340_v20 = vadd.f32 %v1339_v54, %v1277_v34  ;;  %v1208_v55 = vadd.f32 %v1207_v21, %v2176_v9 }
 0x182   : > { %v1341_v37 = vadd.f32 %v1340_v20, %v1278_v52  ;;  %v1209_v24 = vadd.f32 %v1208_v55, %v885_v25 }
 0x184   : > { %v1210_v58 = vrot.slane %v1209_v24, 4  ;;  %v1342_v41 = vadd.f32 %v1341_v37, %v1279_v57 }
 0x186   : > { %v1211_v53 = vadd.f32 %v1210_v58, %v1209_v24  ;;  %v1343_v29 = vrot.slane %v1342_v41, 4 }
 0x188   : > { %v1212_v0 = vrot.slane %v1211_v53, 2  ;;  %v1344_v47 = vadd.f32 %v1343_v29, %v1342_v41 }
 0x18a   : > { %v1213_v44 = vadd.f32 %v1212_v0, %v1211_v53  ;;  %v1345_v56 = vrot.slane %v1344_v47, 2 }
 0x18c   : > { %v1214_v28 = vrot.slane %v1213_v44, 1  ;;  %v1346_v39 = vadd.f32 %v1345_v56, %v1344_v47 }
 0x18e   : > { %v1215_v9 = vadd.f32 %v1214_v28, %v1213_v44  ;;  %v1347_v1 = vrot.slane %v1346_v39, 1 }
 0x190   : > { %v1348_v25 = vadd.f32 %v1347_v1, %v1346_v39  ;;  %1349 = vst [vmem:[%s262_s25] sm:$0xff] %v1215_v9 }
 0x192   : > { %1350 = vst [vmem:[%s266_s28] sm:$0xff] %v1348_v25 }
 0x193 PF: > { %s15_s17 = sadd.s32 1, %s1780_s17   ;;  %s2272_s15 = smov %s1776_s16 }
 0x194   : > { %p12_p6 = scmp.ge.s32.totalorder %s15_s17, 4   ;;  %s2273_s16 = smov %s2275_s18 }
 0x196   :  { %14 = sbr.rel (!%p12_p6) target bundleno = 2 (0x2), region = 93 }

</bundles_post_ra>
